<compile_context>
chip_gen: v7x
topology: tpu7x:2x2x1
jax: 0.10.0
libtpu: 0.0.40
codegen_flags: <defaults>
</compile_context>

<pallas_src>
import jax
import jax.numpy as jnp
from jax import lax
from jax.experimental import pallas as pl
from jax.experimental.pallas import tpu as pltpu

C_IN = 3840
C_OUT = 160


def _conv1x1_kernel(x_ref, w_ref, b_ref, o_ref):
    # x_ref: (rows, C_in) f32      w_ref: (C_in, C_out) bf16
    # b_ref: (1, C_out) f32        o_ref: (rows, C_out) f32
    x_bf = x_ref[...].astype(jnp.bfloat16)            # cheap VPU cast in-kernel
    acc = lax.dot_general(
        x_bf, w_ref[...],
        dimension_numbers=(((1,), (0,)), ((), ())),    # plain x @ w on the MXU
        preferred_element_type=jnp.float32)
    o_ref[...] = acc + b_ref[...]


def prepare_weights(weight, bias):
    """One-time prep: (C_out, C_in, 1, 1) conv weight -> bf16 (C_in, C_out)."""
    c_out, c_in = weight.shape[0], weight.shape[1]
    w_mat = jnp.transpose(weight.reshape(c_out, c_in)).astype(jnp.bfloat16)
    b_mat = bias.reshape(1, c_out).astype(jnp.float32)
    return w_mat, b_mat


@jax.jit
def conv2d_1x1(x_nchw, w_mat, b_mat):
    """x_nchw: (N, C_in, H, W) f32; w_mat: bf16 (C_in, C_out); b_mat: f32 (1, C_out)."""
    n, c_in, h, w = x_nchw.shape
    c_out = w_mat.shape[1]
    rows = n * h * w

    # NCHW -> (rows, C_in). For H=W=1 this is a pure reshape; under jit it
    # fuses with the surrounding graph either way.
    x_mat = jnp.transpose(x_nchw, (0, 2, 3, 1)).reshape(rows, c_in)

    cost = pl.CostEstimate(
        flops=2 * rows * c_in * c_out,
        transcendentals=0,
        bytes_accessed=(c_in * c_out * 2 + rows * c_in * 4
                        + c_out * 4 + rows * c_out * 4),
    )

    # Grid-less single block: whole arrays resident in VMEM (x ~15 KB,
    # w ~1.2 MB bf16, out ~0.6 KB). Entirely bound by the weight HBM fetch;
    # no tiling/pipelining can help inside one call at this size.
    out = pl.pallas_call(
        _conv1x1_kernel,
        out_shape=jax.ShapeDtypeStruct((rows, c_out), jnp.float32),
        in_specs=[pl.BlockSpec(memory_space=pltpu.MemorySpace.VMEM)] * 3,
        out_specs=pl.BlockSpec(memory_space=pltpu.MemorySpace.VMEM),
        cost_estimate=cost,
    )(x_mat, w_mat, b_mat)

    # (rows, C_out) -> NCHW
    out = out.reshape(n, h, w, c_out)
    return jnp.transpose(out, (0, 3, 1, 2))


if __name__ == "__main__":
    key = jax.random.PRNGKey(0)
    k_x, k_w, k_b = jax.random.split(key, 3)

    # Input matching the module's forward: x1028 ~ [1, 3840, 1, 1].
    x = jax.random.normal(k_x, (1, C_IN, 1, 1), dtype=jnp.float32)

    # Conv2d default-style uniform init (fan_in = C_in * 1 * 1).
    bound = 1.0 / (C_IN ** 0.5)
    weight = jax.random.uniform(k_w, (C_OUT, C_IN, 1, 1),
                                minval=-bound, maxval=bound, dtype=jnp.float32)
    bias = jax.random.uniform(k_b, (C_OUT,),
                              minval=-bound, maxval=bound, dtype=jnp.float32)

    w_mat, b_mat = prepare_weights(weight, bias)   # one-time weight prep

    # Reference with the same bf16-cast operands (f32 accumulate) — the bf16
    # weight/activation cast is the only intended numerics change.
    x_bf = x.astype(jnp.bfloat16).astype(jnp.float32)
    w_bf = weight.reshape(C_OUT, C_IN).astype(jnp.bfloat16).astype(jnp.float32)
    y_ref = jnp.einsum("nchw,oc->nohw", x_bf, w_bf) + bias.reshape(1, C_OUT, 1, 1)

    y = jax.block_until_ready(conv2d_1x1(x, w_mat, b_mat))
    assert y.shape == (1, C_OUT, 1, 1), y.shape
    assert jnp.allclose(y, y_ref, atol=2e-3, rtol=2e-3), \
        float(jnp.max(jnp.abs(y - y_ref)))

    # Second call: exercises the cached jit path (no retrace / no recompile).
    y2 = jax.block_until_ready(conv2d_1x1(x, w_mat, b_mat))
    assert jnp.allclose(y2, y_ref, atol=2e-3, rtol=2e-3)

    print("KERNEL_OK")
</pallas_src>

<mosaic_0001>
module attributes {stable_mosaic.version = 11 : i64} {
  func.func @_conv1x1_kernel(%arg0: memref<1x3840xf32, #tpu.memory_space<vmem>>, %arg1: memref<3840x160xbf16, #tpu.memory_space<vmem>>, %arg2: memref<1x160xf32, #tpu.memory_space<vmem>>, %arg3: memref<1x160xf32, #tpu.memory_space<vmem>>) attributes {dimension_semantics = [], scalar_prefetch = 0 : i64, scratch_operands = 0 : i64, tpu.core_type = #tpu.core_type<tc>} {
    %c0 = arith.constant 0 : index
    %c0_0 = arith.constant 0 : index
    %0 = vector.load %arg0[%c0, %c0_0] : memref<1x3840xf32, #tpu.memory_space<vmem>>, vector<1x3840xf32>
    %1 = arith.truncf %0 : vector<1x3840xf32> to vector<1x3840xbf16>
    %c0_1 = arith.constant 0 : index
    %c0_2 = arith.constant 0 : index
    %2 = vector.load %arg1[%c0_1, %c0_2] : memref<3840x160xbf16, #tpu.memory_space<vmem>>, vector<3840x160xbf16>
    %cst = arith.constant dense<0.000000e+00> : vector<1x160xf32>
    %3 = tpu.matmul %1, %2, %cst {dimension_numbers = #tpu.dot_dimension_numbers<[1], [0], [0], [1], [0, 0, 1, 1], [], []>} : vector<1x3840xbf16>, vector<3840x160xbf16>, vector<1x160xf32> -> vector<1x160xf32>
    %c0_3 = arith.constant 0 : index
    %c0_4 = arith.constant 0 : index
    %4 = vector.load %arg2[%c0_3, %c0_4] : memref<1x160xf32, #tpu.memory_space<vmem>>, vector<1x160xf32>
    %5 = arith.addf %3, %4 : vector<1x160xf32>
    %c0_5 = arith.constant 0 : index
    %c0_6 = arith.constant 0 : index
    %6 = vector.load %arg3[%c0_5, %c0_6] : memref<1x160xf32, #tpu.memory_space<vmem>>, vector<1x160xf32>
    tpu.vector_store %arg3[%c0_5, %c0_6], %5 {strides = array<i32>} : memref<1x160xf32, #tpu.memory_space<vmem>>, vector<1x160xf32>,
    return
  }
}

</mosaic_0001>

<bundles_post_ra>
// kernel: conv2d_1x1.1
= control target key start
LH: loop header
LB: loop body
LE: loop exit
PB: predicated region body
PF: predicated region fallthrough
CT: control target
= control target key end

     0   :  { %v23_v36 = vlaneseq  ;;  %s6634_s0 = inlined_call_operand.vmem [shape: f32[1,3840], index: 0, kind: input, shape index: {}]   ;;  %s6635_s1 = inlined_call_operand.vmem [shape: bf16[3840,160], index: 1, kind: input, shape index: {}]   ;;  %s6636_s2 = inlined_call_operand.vmem [shape: f32[1,160], index: 2, kind: input, shape index: {}]   ;;  %s6637_s3 = inlined_call_operand.hbm [shape: f32[1,160], index: 3, kind: output, shape index: {}]  }
   0x1   :  { %v4285_v0 = vld [vmem:[%s6635_s1 + $0x4] ss:$8 sps:$4 sm:$0xff]   ;;  %v4289_v2 = vld [vmem:[%s6635_s1] ss:$8 sps:$4 sm:$0xff]   ;;  %v4291_v4 = vld [vmem:[%s6635_s1 + $0x14] ss:$8 sps:$4 sm:$0xff]  }
   0x2   :  { %v4287_v1 = vld [vmem:[%s6635_s1 + $0x704] ss:$8 sps:$4 sm:$0xff]   ;;  %3095 = vmatprep.subr.bf16.mxu1 %v4285_v0  ;;  %v4290_v3 = vld [vmem:[%s6635_s1 + $0x700] ss:$8 sps:$4 sm:$0xff]   ;;  %v4293_v5 = vld [vmem:[%s6635_s1 + $0x714] ss:$8 sps:$4 sm:$0xff]  }
   0x3   :  { %3382 = vmatprep.subr.bf16.mxu0 %v4287_v1  ;;  %3096 = vmatpush1.bf16.msra.mxu1 %v4289_v2  ;;  %v4295_v6 = vld [vmem:[%s6635_s1 + $0x10] ss:$8 sps:$4 sm:$0xff]   ;;  %v4297_v8 = vld [vmem:[%s6635_s1 + $0x24] ss:$8 sps:$4 sm:$0xff]   ;;  %v4301_v10 = vld [vmem:[%s6635_s1 + $0x20] ss:$8 sps:$4 sm:$0xff]  }
   0x4   :  { %3383 = vmatpush1.bf16.msra.mxu0 %v4290_v3  ;;  %3097 = vmatprep.subr.bf16.mxu1 %v4291_v4  ;;  %v4296_v7 = vld [vmem:[%s6635_s1 + $0x710] ss:$8 sps:$4 sm:$0xff]   ;;  %v4299_v9 = vld [vmem:[%s6635_s1 + $0x724] ss:$8 sps:$4 sm:$0xff]   ;;  %v4302_v11 = vld [vmem:[%s6635_s1 + $0x720] ss:$8 sps:$4 sm:$0xff]  }
   0x5   :  { %3384 = vmatprep.subr.bf16.mxu0 %v4293_v5  ;;  %v4303_v12 = vld [vmem:[%s6635_s1 + $0x34] ss:$8 sps:$4 sm:$0xff]   ;;  %v4307_v14 = vld [vmem:[%s6635_s1 + $0x30] ss:$8 sps:$4 sm:$0xff]   ;;  %v4309_v16 = vld [vmem:[%s6635_s1 + $0x44] ss:$8 sps:$4 sm:$0xff]  }
   0x6   :  { %v4305_v13 = vld [vmem:[%s6635_s1 + $0x734] ss:$8 sps:$4 sm:$0xff]   ;;  %v4308_v15 = vld [vmem:[%s6635_s1 + $0x730] ss:$8 sps:$4 sm:$0xff]   ;;  %v4311_v17 = vld [vmem:[%s6635_s1 + $0x744] ss:$8 sps:$4 sm:$0xff]  }
   0x7   :  { %3098 = vmatpush1.bf16.msra.mxu1 %v4295_v6  ;;  %v4313_v18 = vld [vmem:[%s6635_s1 + $0x40] ss:$8 sps:$4 sm:$0xff]   ;;  %v4315_v20 = vld [vmem:[%s6635_s1 + $0x54] ss:$8 sps:$4 sm:$0xff]   ;;  %v4319_v22 = vld [vmem:[%s6635_s1 + $0x50] ss:$8 sps:$4 sm:$0xff]  }
   0x8   :  { %3385 = vmatpush1.bf16.msra.mxu0 %v4296_v7  ;;  %3099 = vmatprep.subr.bf16.mxu1 %v4297_v8  ;;  %v4314_v19 = vld [vmem:[%s6635_s1 + $0x740] ss:$8 sps:$4 sm:$0xff]   ;;  %v4317_v21 = vld [vmem:[%s6635_s1 + $0x754] ss:$8 sps:$4 sm:$0xff]   ;;  %v4320_v23 = vld [vmem:[%s6635_s1 + $0x750] ss:$8 sps:$4 sm:$0xff]  }
   0x9   :  { %3386 = vmatprep.subr.bf16.mxu0 %v4299_v9  ;;  %v4321_v24 = vld [vmem:[%s6635_s1 + $0x64] ss:$8 sps:$4 sm:$0xff]   ;;  %v4325_v26 = vld [vmem:[%s6635_s1 + $0x60] ss:$8 sps:$4 sm:$0xff]   ;;  %v4327_v28 = vld [vmem:[%s6635_s1 + $0x74] ss:$8 sps:$4 sm:$0xff]  }
   0xa   :  { %v4323_v25 = vld [vmem:[%s6635_s1 + $0x764] ss:$8 sps:$4 sm:$0xff]   ;;  %v4326_v27 = vld [vmem:[%s6635_s1 + $0x760] ss:$8 sps:$4 sm:$0xff]   ;;  %v4329_v29 = vld [vmem:[%s6635_s1 + $0x774] ss:$8 sps:$4 sm:$0xff]  }
   0xb   :  { %3100 = vmatpush1.bf16.msra.mxu1 %v4301_v10  ;;  %v4331_v30 = vld [vmem:[%s6635_s1 + $0x70] ss:$8 sps:$4 sm:$0xff]   ;;  %v4333_v32 = vld [vmem:[%s6635_s1 + $0x84] ss:$8 sps:$4 sm:$0xff]   ;;  %v4337_v34 = vld [vmem:[%s6635_s1 + $0x80] ss:$8 sps:$4 sm:$0xff]  }
   0xc   :  { %3387 = vmatpush1.bf16.msra.mxu0 %v4302_v11  ;;  %3101 = vmatprep.subr.bf16.mxu1 %v4303_v12  ;;  %v4332_v31 = vld [vmem:[%s6635_s1 + $0x770] ss:$8 sps:$4 sm:$0xff]   ;;  %v4335_v33 = vld [vmem:[%s6635_s1 + $0x784] ss:$8 sps:$4 sm:$0xff]   ;;  %v4338_v35 = vld [vmem:[%s6635_s1 + $0x780] ss:$8 sps:$4 sm:$0xff]  }
   0xd   :  { %3388 = vmatprep.subr.bf16.mxu0 %v4305_v13  ;;  %v4339_v37 = vld [vmem:[%s6635_s1 + $0x94] ss:$8 sps:$4 sm:$0xff]   ;;  %v4343_v39 = vld [vmem:[%s6635_s1 + $0x90] ss:$8 sps:$4 sm:$0xff]   ;;  %v5173_v40 = vshrl.u32 %v23_v36, 7  ;;  %v5205_v50 = vld [vmem:[%s6634_s0] sm:$0xff] }
   0xe   :  { %v4341_v38 = vld [vmem:[%s6635_s1 + $0x794] ss:$8 sps:$4 sm:$0xff]   ;;  %v4344_v41 = vld [vmem:[%s6635_s1 + $0x790] ss:$8 sps:$4 sm:$0xff]   ;;  %v4345_v42 = vld [vmem:[%s6635_s1 + $0xa4] ss:$8 sps:$4 sm:$0xff]  }
   0xf   :  { %3102 = vmatpush1.bf16.msra.mxu1 %v4307_v14  ;;  %v4347_v43 = vld [vmem:[%s6635_s1 + $0x7a4] ss:$8 sps:$4 sm:$0xff]   ;;  %v4349_v44 = vld [vmem:[%s6635_s1 + $0xa0] ss:$8 sps:$4 sm:$0xff]   ;;  %v5191_v46 = vsub.s32 1, %v5173_v40  ;;  %v5200_v49 = vsub.s32 7, %v5173_v40 }
  0x10   :  { %3389 = vmatpush1.bf16.msra.mxu0 %v4308_v15  ;;  %3103 = vmatprep.subr.bf16.mxu1 %v4309_v16  ;;  %v4350_v45 = vld [vmem:[%s6635_s1 + $0x7a0] ss:$8 sps:$4 sm:$0xff]   ;;  %v4351_v47 = vld [vmem:[%s6635_s1 + $0xb4] ss:$8 sps:$4 sm:$0xff]   ;;  %v4355_v51 = vld [vmem:[%s6635_s1 + $0xb0] ss:$8 sps:$4 sm:$0xff]  }
  0x11   :  { %3390 = vmatprep.subr.bf16.mxu0 %v4311_v17  ;;  %v4353_v48 = vld [vmem:[%s6635_s1 + $0x7b4] ss:$8 sps:$4 sm:$0xff]   ;;  %v30_v52 = vrot.slane %v5205_v50, %v5191_v46  ;;  %v4356_v53 = vld [vmem:[%s6635_s1 + $0x7b0] ss:$8 sps:$4 sm:$0xff]   ;;  %v16_v54 = vld [vmem:[%s6634_s0 + $0x8] sm:$0xff]  ;;  %v5250_v4 = vsub.s32 0, %v5173_v40 }
  0x12   :  { %v4357_v55 = vld [vmem:[%s6635_s1 + $0xc4] ss:$8 sps:$4 sm:$0xff]   ;;  %v86_v58 = vrot.slane %v16_v54, %v5200_v49  ;;  %v4361_v60 = vld [vmem:[%s6635_s1 + $0xc0] ss:$8 sps:$4 sm:$0xff]   ;;  %v4363_v62 = vld [vmem:[%s6635_s1 + $0xd4] ss:$8 sps:$4 sm:$0xff]  }
  0x13   :  { %3104 = vmatpush1.bf16.msra.mxu1 %v4313_v18  ;;  %v4359_v56 = vld [vmem:[%s6635_s1 + $0x7c4] ss:$8 sps:$4 sm:$0xff]   ;;  %v174_v57 = vpack.c.bf16 %v30_v52, %v30_v52  ;;  %v4362_v61 = vld [vmem:[%s6635_s1 + $0x7c0] ss:$8 sps:$4 sm:$0xff]   ;;  %v4365_v63 = vld [vmem:[%s6635_s1 + $0x7d4] ss:$8 sps:$4 sm:$0xff]   ;;  %v26_v11 = vrot.slane %v5205_v50, %v5250_v4 }
  0x14   :  { %3391 = vmatpush1.bf16.msra.mxu0 %v4314_v19  ;;  %3105 = vmatprep.subr.bf16.mxu1 %v4315_v20  ;;  %v188_v59 = vpack.c.bf16 %v86_v58, %v86_v58  ;;  %v4367_v0 = vld [vmem:[%s6635_s1 + $0xd0] ss:$8 sps:$4 sm:$0xff]   ;;  %v4369_v2 = vld [vmem:[%s6635_s1 + $0xe4] ss:$8 sps:$4 sm:$0xff]   ;;  %v5253_v5 = vsub.s32 6, %v5173_v40  ;;  %v5268_v10 = vsub.s32 3, %v5173_v40 }
  0x15   :  { %3392 = vmatprep.subr.bf16.mxu0 %v4317_v21  ;;  %3127 = vmatprep.mubr.bf16.mxu1 %v174_v57  ;;  %v4368_v1 = vld [vmem:[%s6635_s1 + $0x7d0] ss:$8 sps:$4 sm:$0xff]   ;;  %v4371_v3 = vld [vmem:[%s6635_s1 + $0x7e4] ss:$8 sps:$4 sm:$0xff]   ;;  %v4373_v6 = vld [vmem:[%s6635_s1 + $0xe0] ss:$8 sps:$4 sm:$0xff]   ;;  %v173_v18 = vpack.c.bf16 %v26_v11, %v26_v11 }
  0x16   :  { %3414 = vmatprep.mubr.bf16.mxu0 %v188_v59  ;;  %v4374_v7 = vld [vmem:[%s6635_s1 + $0x7e0] ss:$8 sps:$4 sm:$0xff]   ;;  %v4375_v8 = vld [vmem:[%s6635_s1 + $0xf4] ss:$8 sps:$4 sm:$0xff]   ;;  %v82_v12 = vrot.slane %v16_v54, %v5253_v5  ;;  %v4379_v13 = vld [vmem:[%s6635_s1 + $0xf0] ss:$8 sps:$4 sm:$0xff]   ;;  %v38_v17 = vrot.slane %v5205_v50, %v5268_v10 }
  0x17   :  { %3106 = vmatpush1.bf16.msra.mxu1 %v4319_v22  ;;  %v4377_v9 = vld [vmem:[%s6635_s1 + $0x7f4] ss:$8 sps:$4 sm:$0xff]   ;;  %v4380_v14 = vld [vmem:[%s6635_s1 + $0x7f0] ss:$8 sps:$4 sm:$0xff]   ;;  %v4383_v15 = vld [vmem:[%s6635_s1 + $0x104] ss:$8 sps:$4 sm:$0xff]  }
  0x18   :  { %3393 = vmatpush1.bf16.msra.mxu0 %v4320_v23  ;;  %3107 = vmatprep.subr.bf16.mxu1 %v4321_v24  ;;  %v4386_v16 = vld [vmem:[%s6635_s1 + $0x804] ss:$8 sps:$4 sm:$0xff]   ;;  %v187_v19 = vpack.c.bf16 %v82_v12, %v82_v12  ;;  %v4381_v20 = vld [vmem:[%s6635_s1 + $0x100] ss:$8 sps:$4 sm:$0xff]   ;;  %v4389_v22 = vld [vmem:[%s6635_s1 + $0x114] ss:$8 sps:$4 sm:$0xff]   ;;  %v176_v24 = vpack.c.bf16 %v38_v17, %v38_v17 }
  0x19   :  { %3394 = vmatprep.subr.bf16.mxu0 %v4323_v25  ;;  %v4384_v21 = vld [vmem:[%s6635_s1 + $0x800] ss:$8 sps:$4 sm:$0xff]   ;;  %v4392_v23 = vld [vmem:[%s6635_s1 + $0x814] ss:$8 sps:$4 sm:$0xff]   ;;  %v4387_v25 = vld [vmem:[%s6635_s1 + $0x110] ss:$8 sps:$4 sm:$0xff]  }
  0x1a   :  { %v4420_v52 = vld [vmem:[%s6635_s1 + $0x860] ss:$8 sps:$4 sm:$0xff]   ;;  %v4423_v57 = vld [vmem:[%s6635_s1 + $0x170] ss:$8 sps:$4 sm:$0xff]   ;;  %v4431_v59 = vld [vmem:[%s6635_s1 + $0x184] ss:$8 sps:$4 sm:$0xff]  }
  0x1b   :  { %3108 = vmatpush1.bf16.msra.mxu1 %v4325_v26  ;;  %v4390_v26 = vld [vmem:[%s6635_s1 + $0x810] ss:$8 sps:$4 sm:$0xff]   ;;  %v4452_v11 = vld [vmem:[%s6635_s1 + $0x8b4] ss:$8 sps:$4 sm:$0xff]   ;;  %v4456_v17 = vld [vmem:[%s6635_s1 + $0x8c0] ss:$8 sps:$4 sm:$0xff]  }
  0x1c   :  { %3395 = vmatpush1.bf16.msra.mxu0 %v4326_v27  ;;  %3109 = vmatprep.subr.bf16.mxu1 %v4327_v28  ;;  %v4395_v27 = vld [vmem:[%s6635_s1 + $0x124] ss:$8 sps:$4 sm:$0xff]   ;;  %v4426_v58 = vld [vmem:[%s6635_s1 + $0x870] ss:$8 sps:$4 sm:$0xff]  }
  0x1d   :  { %3396 = vmatprep.subr.bf16.mxu0 %v4329_v29  ;;  %v4398_v28 = vld [vmem:[%s6635_s1 + $0x824] ss:$8 sps:$4 sm:$0xff]   ;;  %v4393_v29 = vld [vmem:[%s6635_s1 + $0x120] ss:$8 sps:$4 sm:$0xff]   ;;  %v4447_v12 = vld [vmem:[%s6635_s1 + $0x1b0] ss:$8 sps:$4 sm:$0xff]  }
  0x1f   :  { %3110 = vmatpush1.bf16.msra.mxu1 %v4331_v30  ;;  %v4396_v30 = vld [vmem:[%s6635_s1 + $0x820] ss:$8 sps:$4 sm:$0xff]  }
  0x20   :  { %3397 = vmatpush1.bf16.msra.mxu0 %v4332_v31  ;;  %3111 = vmatprep.subr.bf16.mxu1 %v4333_v32  ;;  %v4401_v31 = vld [vmem:[%s6635_s1 + $0x134] ss:$8 sps:$4 sm:$0xff]  }
  0x21   :  { %3398 = vmatprep.subr.bf16.mxu0 %v4335_v33  ;;  %v4404_v32 = vld [vmem:[%s6635_s1 + $0x834] ss:$8 sps:$4 sm:$0xff]   ;;  %v4399_v33 = vld [vmem:[%s6635_s1 + $0x130] ss:$8 sps:$4 sm:$0xff]  }
  0x23   :  { %3112 = vmatpush1.bf16.msra.mxu1 %v4337_v34  ;;  %v4402_v34 = vld [vmem:[%s6635_s1 + $0x830] ss:$8 sps:$4 sm:$0xff]  }
  0x24   :  { %3399 = vmatpush1.bf16.msra.mxu0 %v4338_v35  ;;  %3113 = vmatprep.subr.bf16.mxu1 %v4339_v37  ;;  %v4407_v35 = vld [vmem:[%s6635_s1 + $0x144] ss:$8 sps:$4 sm:$0xff]  }
  0x25   :  { %3400 = vmatprep.subr.bf16.mxu0 %v4341_v38  ;;  %v4410_v37 = vld [vmem:[%s6635_s1 + $0x844] ss:$8 sps:$4 sm:$0xff]   ;;  %v4405_v38 = vld [vmem:[%s6635_s1 + $0x140] ss:$8 sps:$4 sm:$0xff]  }
  0x27   :  { %3114 = vmatpush1.bf16.msra.mxu1 %v4343_v39  ;;  %v4408_v39 = vld [vmem:[%s6635_s1 + $0x840] ss:$8 sps:$4 sm:$0xff]  }
  0x28   :  { %3401 = vmatpush1.bf16.msra.mxu0 %v4344_v41  ;;  %3115 = vmatprep.subr.bf16.mxu1 %v4345_v42  ;;  %v4413_v41 = vld [vmem:[%s6635_s1 + $0x154] ss:$8 sps:$4 sm:$0xff]  }
  0x29   :  { %3402 = vmatprep.subr.bf16.mxu0 %v4347_v43  ;;  %v4416_v42 = vld [vmem:[%s6635_s1 + $0x854] ss:$8 sps:$4 sm:$0xff]   ;;  %v4411_v43 = vld [vmem:[%s6635_s1 + $0x150] ss:$8 sps:$4 sm:$0xff]  }
  0x2b   :  { %3116 = vmatpush1.bf16.msra.mxu1 %v4349_v44  ;;  %v4414_v44 = vld [vmem:[%s6635_s1 + $0x850] ss:$8 sps:$4 sm:$0xff]  }
  0x2c   :  { %3403 = vmatpush1.bf16.msra.mxu0 %v4350_v45  ;;  %3117 = vmatprep.subr.bf16.mxu1 %v4351_v47  ;;  %v4419_v45 = vld [vmem:[%s6635_s1 + $0x164] ss:$8 sps:$4 sm:$0xff]  }
  0x2d   :  { %3404 = vmatprep.subr.bf16.mxu0 %v4353_v48  ;;  %v4422_v47 = vld [vmem:[%s6635_s1 + $0x864] ss:$8 sps:$4 sm:$0xff]   ;;  %v4417_v48 = vld [vmem:[%s6635_s1 + $0x160] ss:$8 sps:$4 sm:$0xff]  }
  0x2f   :  { %3118 = vmatpush1.bf16.msra.mxu1 %v4355_v51  ;;  %v5365_v51 = vld [vmem:[%s6634_s0 + $0x10] sm:$0xff] }
  0x30   :  { %3405 = vmatpush1.bf16.msra.mxu0 %v4356_v53  ;;  %3119 = vmatprep.subr.bf16.mxu1 %v4357_v55  ;;  %v4425_v53 = vld [vmem:[%s6635_s1 + $0x174] ss:$8 sps:$4 sm:$0xff]   ;;  %v94_v54 = vrot.slane %v5365_v51, %v5191_v46 }
  0x31   :  { %3406 = vmatprep.subr.bf16.mxu0 %v4359_v56  ;;  %v4428_v55 = vld [vmem:[%s6635_s1 + $0x874] ss:$8 sps:$4 sm:$0xff]  }
  0x32   :  { %v190_v56 = vpack.c.bf16 %v94_v54, %v94_v54  ;;  %v4494_v54 = vld [vmem:[%s6635_s1 + $0x924] ss:$8 sps:$4 sm:$0xff]  }
  0x33   :  { %3120 = vmatpush1.bf16.msra.mxu1 %v4361_v60  ;;  %v4434_v60 = vld [vmem:[%s6635_s1 + $0x884] ss:$8 sps:$4 sm:$0xff]  }
  0x34   :  { %3407 = vmatpush1.bf16.msra.mxu0 %v4362_v61  ;;  %3121 = vmatprep.subr.bf16.mxu1 %v4363_v62  ;;  %v4429_v61 = vld [vmem:[%s6635_s1 + $0x180] ss:$8 sps:$4 sm:$0xff]  }
  0x35   :  { %3408 = vmatprep.subr.bf16.mxu0 %v4365_v63  ;;  %v4432_v62 = vld [vmem:[%s6635_s1 + $0x880] ss:$8 sps:$4 sm:$0xff]   ;;  %v4437_v63 = vld [vmem:[%s6635_s1 + $0x194] ss:$8 sps:$4 sm:$0xff]  }
  0x37   :  { %3122 = vmatpush1.bf16.msra.mxu1 %v4367_v0  ;;  %v4440_v0 = vld [vmem:[%s6635_s1 + $0x894] ss:$8 sps:$4 sm:$0xff]  }
  0x38   :  { %3409 = vmatpush1.bf16.msra.mxu0 %v4368_v1  ;;  %3123 = vmatprep.subr.bf16.mxu1 %v4369_v2  ;;  %v4435_v1 = vld [vmem:[%s6635_s1 + $0x190] ss:$8 sps:$4 sm:$0xff]  }
  0x39   :  { %3410 = vmatprep.subr.bf16.mxu0 %v4371_v3  ;;  %v4438_v2 = vld [vmem:[%s6635_s1 + $0x890] ss:$8 sps:$4 sm:$0xff]   ;;  %v4443_v3 = vld [vmem:[%s6635_s1 + $0x1a4] ss:$8 sps:$4 sm:$0xff]  }
  0x3b   :  { %3124 = vmatpush1.bf16.msra.mxu1 %v4373_v6  ;;  %v4446_v6 = vld [vmem:[%s6635_s1 + $0x8a4] ss:$8 sps:$4 sm:$0xff]  }
  0x3c   :  { %3411 = vmatpush1.bf16.msra.mxu0 %v4374_v7  ;;  %3125 = vmatprep.subr.bf16.mxu1 %v4375_v8  ;;  %v4441_v7 = vld [vmem:[%s6635_s1 + $0x1a0] ss:$8 sps:$4 sm:$0xff]  }
  0x3d   :  { %3412 = vmatprep.subr.bf16.mxu0 %v4377_v9  ;;  %v4444_v8 = vld [vmem:[%s6635_s1 + $0x8a0] ss:$8 sps:$4 sm:$0xff]   ;;  %v4449_v9 = vld [vmem:[%s6635_s1 + $0x1b4] ss:$8 sps:$4 sm:$0xff]  }
  0x3f   :  { %3126 = vmatpush1.bf16.msra.mxu1 %v4379_v13  ;;  %v4450_v13 = vld [vmem:[%s6635_s1 + $0x8b0] ss:$8 sps:$4 sm:$0xff]  }
  0x40   :  { %3413 = vmatpush1.bf16.msra.mxu0 %v4380_v14  ;;  %3136 = vmatprep.subr.bf16.mxu1 %v4383_v15  ;;  %v4455_v14 = vld [vmem:[%s6635_s1 + $0x1c4] ss:$8 sps:$4 sm:$0xff]  }
  0x41   :  { %3423 = vmatprep.subr.bf16.mxu0 %v4386_v16  ;;  %v4458_v15 = vld [vmem:[%s6635_s1 + $0x8c4] ss:$8 sps:$4 sm:$0xff]   ;;  %v4453_v16 = vld [vmem:[%s6635_s1 + $0x1c0] ss:$8 sps:$4 sm:$0xff]  }
  0x42   :  { %3128 = vmatmul.mubr.bf16.vlgmr.msra.gmra.mrb[0].mxu1 %v173_v18  ;;  %v4461_v18 = vld [vmem:[%s6635_s1 + $0x1d4] ss:$8 sps:$4 sm:$0xff]  }
  0x43   :  { %3415 = vmatmul.mubr.bf16.vlgmr.msra.gmra.mrb[0].mxu0 %v187_v19  ;;  %3137 = vmatpush1.bf16.msra.mxu1 %v4381_v20  ;;  %v4464_v19 = vld [vmem:[%s6635_s1 + $0x8d4] ss:$8 sps:$4 sm:$0xff]   ;;  %v4459_v20 = vld [vmem:[%s6635_s1 + $0x1d0] ss:$8 sps:$4 sm:$0xff]  }
  0x44   :  { %3424 = vmatpush1.bf16.msra.mxu0 %v4384_v21  ;;  %3138 = vmatprep.subr.bf16.mxu1 %v4389_v22  ;;  %v4462_v21 = vld [vmem:[%s6635_s1 + $0x8d0] ss:$8 sps:$4 sm:$0xff]   ;;  %v4467_v22 = vld [vmem:[%s6635_s1 + $0x1e4] ss:$8 sps:$4 sm:$0xff]  }
  0x45   :  { %3425 = vmatprep.subr.bf16.mxu0 %v4392_v23  ;;  %3168 = vmatprep.mubr.bf16.mxu1 %v176_v24  ;;  %v4470_v23 = vld [vmem:[%s6635_s1 + $0x8e4] ss:$8 sps:$4 sm:$0xff]   ;;  %v4465_v24 = vld [vmem:[%s6635_s1 + $0x1e0] ss:$8 sps:$4 sm:$0xff]  }
  0x46   :  { %3455 = vmatprep.mubr.bf16.mxu0 %v190_v56  ;;  %v4492_v56 = vld [vmem:[%s6635_s1 + $0x920] ss:$8 sps:$4 sm:$0xff]  }
  0x47   :  { %3139 = vmatpush1.bf16.msra.mxu1 %v4387_v25  ;;  %v5466_v25 = vsub.s32 2, %v5173_v40 }
  0x48   :  { %3426 = vmatpush1.bf16.msra.mxu0 %v4390_v26  ;;  %3140 = vmatprep.subr.bf16.mxu1 %v4395_v27  ;;  %v4468_v26 = vld [vmem:[%s6635_s1 + $0x8e0] ss:$8 sps:$4 sm:$0xff]   ;;  %v4473_v27 = vld [vmem:[%s6635_s1 + $0x1f4] ss:$8 sps:$4 sm:$0xff]  }
  0x49   :  { %3427 = vmatprep.subr.bf16.mxu0 %v4398_v28  ;;  %v4476_v28 = vld [vmem:[%s6635_s1 + $0x8f4] ss:$8 sps:$4 sm:$0xff]  }
  0x4b   :  { %3141 = vmatpush1.bf16.msra.mxu1 %v4393_v29  ;;  %v5478_v29 = vsub.s32 5, %v5173_v40 }
  0x4c   :  { %3428 = vmatpush1.bf16.msra.mxu0 %v4396_v30  ;;  %3142 = vmatprep.subr.bf16.mxu1 %v4401_v31  ;;  %v4471_v30 = vld [vmem:[%s6635_s1 + $0x1f0] ss:$8 sps:$4 sm:$0xff]   ;;  %v34_v31 = vrot.slane %v5205_v50, %v5466_v25 }
  0x4d   :  { %3429 = vmatprep.subr.bf16.mxu0 %v4404_v32  ;;  %v90_v32 = vrot.slane %v5365_v51, %v5250_v4 }
  0x4f   :  { %3143 = vmatpush1.bf16.msra.mxu1 %v4399_v33  ;;  %v4474_v33 = vld [vmem:[%s6635_s1 + $0x8f0] ss:$8 sps:$4 sm:$0xff]  }
  0x50   :  { %3430 = vmatpush1.bf16.msra.mxu0 %v4402_v34  ;;  %3144 = vmatprep.subr.bf16.mxu1 %v4407_v35  ;;  %v4479_v34 = vld [vmem:[%s6635_s1 + $0x204] ss:$8 sps:$4 sm:$0xff]  }
  0x51   :  { %3431 = vmatprep.subr.bf16.mxu0 %v4410_v37  ;;  %v4482_v35 = vld [vmem:[%s6635_s1 + $0x904] ss:$8 sps:$4 sm:$0xff]   ;;  %v46_v37 = vrot.slane %v5205_v50, %v5478_v29  ;;  %v4488_v50 = vld [vmem:[%s6635_s1 + $0x914] ss:$8 sps:$4 sm:$0xff]  }
  0x53   :  { %3145 = vmatpush1.bf16.msra.mxu1 %v4405_v38  ;;  %v102_v38 = vrot.slane %v5365_v51, %v5268_v10 }
  0x54   :  { %3432 = vmatpush1.bf16.msra.mxu0 %v4408_v39  ;;  %3146 = vmatprep.subr.bf16.mxu1 %v4413_v41  ;;  %v4477_v39 = vld [vmem:[%s6635_s1 + $0x200] ss:$8 sps:$4 sm:$0xff]   ;;  %v175_v41 = vpack.c.bf16 %v34_v31, %v34_v31  ;;  %v4548_v31 = vld [vmem:[%s6635_s1 + $0x9b4] ss:$8 sps:$4 sm:$0xff]  }
  0x55   :  { %3433 = vmatprep.subr.bf16.mxu0 %v4416_v42  ;;  %v189_v42 = vpack.c.bf16 %v90_v32, %v90_v32  ;;  %v4543_v32 = vld [vmem:[%s6635_s1 + $0x2b0] ss:$8 sps:$4 sm:$0xff]  }
  0x57   :  { %3147 = vmatpush1.bf16.msra.mxu1 %v4411_v43  ;;  %v4480_v43 = vld [vmem:[%s6635_s1 + $0x900] ss:$8 sps:$4 sm:$0xff]  }
  0x58   :  { %3434 = vmatpush1.bf16.msra.mxu0 %v4414_v44  ;;  %3148 = vmatprep.subr.bf16.mxu1 %v4419_v45  ;;  %v4485_v44 = vld [vmem:[%s6635_s1 + $0x214] ss:$8 sps:$4 sm:$0xff]   ;;  %v178_v45 = vpack.c.bf16 %v46_v37, %v46_v37  ;;  %v4549_v37 = vld [vmem:[%s6635_s1 + $0x2c0] ss:$8 sps:$4 sm:$0xff]  }
  0x59   :  { %3435 = vmatprep.subr.bf16.mxu0 %v4422_v47  ;;  %v192_v47 = vpack.c.bf16 %v102_v38, %v102_v38  ;;  %v4552_v38 = vld [vmem:[%s6635_s1 + $0x9c0] ss:$8 sps:$4 sm:$0xff]  }
  0x5b   :  { %3149 = vmatpush1.bf16.msra.mxu1 %v4417_v48  ;;  %v4483_v48 = vld [vmem:[%s6635_s1 + $0x210] ss:$8 sps:$4 sm:$0xff]  }
  0x5c   :  { %3436 = vmatpush1.bf16.msra.mxu0 %v4420_v52  ;;  %3150 = vmatprep.subr.bf16.mxu1 %v4425_v53  ;;  %v4486_v52 = vld [vmem:[%s6635_s1 + $0x910] ss:$8 sps:$4 sm:$0xff]   ;;  %v4491_v53 = vld [vmem:[%s6635_s1 + $0x224] ss:$8 sps:$4 sm:$0xff]  }
  0x5d   :  { %3437 = vmatprep.subr.bf16.mxu0 %v4428_v55  ;;  %v4489_v55 = vld [vmem:[%s6635_s1 + $0x220] ss:$8 sps:$4 sm:$0xff]  }
  0x5f   :  { %3151 = vmatpush1.bf16.msra.mxu1 %v4423_v57  ;;  %v4497_v57 = vld [vmem:[%s6635_s1 + $0x234] ss:$8 sps:$4 sm:$0xff]  }
  0x60   :  { %3438 = vmatpush1.bf16.msra.mxu0 %v4426_v58  ;;  %3152 = vmatprep.subr.bf16.mxu1 %v4431_v59  ;;  %v4500_v58 = vld [vmem:[%s6635_s1 + $0x934] ss:$8 sps:$4 sm:$0xff]   ;;  %v4495_v59 = vld [vmem:[%s6635_s1 + $0x230] ss:$8 sps:$4 sm:$0xff]  }
  0x61   :  { %3439 = vmatprep.subr.bf16.mxu0 %v4434_v60  ;;  %v4498_v60 = vld [vmem:[%s6635_s1 + $0x930] ss:$8 sps:$4 sm:$0xff]  }
  0x63   :  { %3153 = vmatpush1.bf16.msra.mxu1 %v4429_v61  ;;  %v4503_v61 = vld [vmem:[%s6635_s1 + $0x244] ss:$8 sps:$4 sm:$0xff]  }
  0x64   :  { %3440 = vmatpush1.bf16.msra.mxu0 %v4432_v62  ;;  %3154 = vmatprep.subr.bf16.mxu1 %v4437_v63  ;;  %v4506_v62 = vld [vmem:[%s6635_s1 + $0x944] ss:$8 sps:$4 sm:$0xff]   ;;  %v4501_v63 = vld [vmem:[%s6635_s1 + $0x240] ss:$8 sps:$4 sm:$0xff]  }
  0x65   :  { %3441 = vmatprep.subr.bf16.mxu0 %v4440_v0  ;;  %v4504_v0 = vld [vmem:[%s6635_s1 + $0x940] ss:$8 sps:$4 sm:$0xff]  }
  0x67   :  { %3155 = vmatpush1.bf16.msra.mxu1 %v4435_v1  ;;  %v4509_v1 = vld [vmem:[%s6635_s1 + $0x254] ss:$8 sps:$4 sm:$0xff]  }
  0x68   :  { %3442 = vmatpush1.bf16.msra.mxu0 %v4438_v2  ;;  %3156 = vmatprep.subr.bf16.mxu1 %v4443_v3  ;;  %v4512_v2 = vld [vmem:[%s6635_s1 + $0x954] ss:$8 sps:$4 sm:$0xff]   ;;  %v4507_v3 = vld [vmem:[%s6635_s1 + $0x250] ss:$8 sps:$4 sm:$0xff]  }
  0x69   :  { %3443 = vmatprep.subr.bf16.mxu0 %v4446_v6  ;;  %v4510_v6 = vld [vmem:[%s6635_s1 + $0x950] ss:$8 sps:$4 sm:$0xff]  }
  0x6b   :  { %3157 = vmatpush1.bf16.msra.mxu1 %v4441_v7  ;;  %v4515_v7 = vld [vmem:[%s6635_s1 + $0x264] ss:$8 sps:$4 sm:$0xff]  }
  0x6c   :  { %3444 = vmatpush1.bf16.msra.mxu0 %v4444_v8  ;;  %3158 = vmatprep.subr.bf16.mxu1 %v4449_v9  ;;  %v4518_v8 = vld [vmem:[%s6635_s1 + $0x964] ss:$8 sps:$4 sm:$0xff]   ;;  %v4513_v9 = vld [vmem:[%s6635_s1 + $0x260] ss:$8 sps:$4 sm:$0xff]  }
  0x6d   :  { %3445 = vmatprep.subr.bf16.mxu0 %v4452_v11  ;;  %v4516_v11 = vld [vmem:[%s6635_s1 + $0x960] ss:$8 sps:$4 sm:$0xff]  }
  0x6f   :  { %3159 = vmatpush1.bf16.msra.mxu1 %v4447_v12  ;;  %v4521_v12 = vld [vmem:[%s6635_s1 + $0x274] ss:$8 sps:$4 sm:$0xff]  }
  0x70   :  { %3446 = vmatpush1.bf16.msra.mxu0 %v4450_v13  ;;  %3160 = vmatprep.subr.bf16.mxu1 %v4455_v14  ;;  %v4524_v13 = vld [vmem:[%s6635_s1 + $0x974] ss:$8 sps:$4 sm:$0xff]   ;;  %v4519_v14 = vld [vmem:[%s6635_s1 + $0x270] ss:$8 sps:$4 sm:$0xff]  }
  0x71   :  { %3447 = vmatprep.subr.bf16.mxu0 %v4458_v15  ;;  %v4522_v15 = vld [vmem:[%s6635_s1 + $0x970] ss:$8 sps:$4 sm:$0xff]  }
  0x73   :  { %3161 = vmatpush1.bf16.msra.mxu1 %v4453_v16  ;;  %v4527_v16 = vld [vmem:[%s6635_s1 + $0x284] ss:$8 sps:$4 sm:$0xff]  }
  0x74   :  { %3448 = vmatpush1.bf16.msra.mxu0 %v4456_v17  ;;  %3162 = vmatprep.subr.bf16.mxu1 %v4461_v18  ;;  %v4530_v17 = vld [vmem:[%s6635_s1 + $0x984] ss:$8 sps:$4 sm:$0xff]   ;;  %v4525_v18 = vld [vmem:[%s6635_s1 + $0x280] ss:$8 sps:$4 sm:$0xff]  }
  0x75   :  { %3449 = vmatprep.subr.bf16.mxu0 %v4464_v19  ;;  %v4528_v19 = vld [vmem:[%s6635_s1 + $0x980] ss:$8 sps:$4 sm:$0xff]  }
  0x77   :  { %3163 = vmatpush1.bf16.msra.mxu1 %v4459_v20  ;;  %v4533_v20 = vld [vmem:[%s6635_s1 + $0x294] ss:$8 sps:$4 sm:$0xff]  }
  0x78   :  { %3450 = vmatpush1.bf16.msra.mxu0 %v4462_v21  ;;  %3164 = vmatprep.subr.bf16.mxu1 %v4467_v22  ;;  %v4536_v21 = vld [vmem:[%s6635_s1 + $0x994] ss:$8 sps:$4 sm:$0xff]   ;;  %v4531_v22 = vld [vmem:[%s6635_s1 + $0x290] ss:$8 sps:$4 sm:$0xff]  }
  0x79   :  { %3451 = vmatprep.subr.bf16.mxu0 %v4470_v23  ;;  %v4534_v23 = vld [vmem:[%s6635_s1 + $0x990] ss:$8 sps:$4 sm:$0xff]  }
  0x7b   :  { %3165 = vmatpush1.bf16.msra.mxu1 %v4465_v24  ;;  %v4539_v24 = vld [vmem:[%s6635_s1 + $0x2a4] ss:$8 sps:$4 sm:$0xff]  }
  0x7c   :  { %3452 = vmatpush1.bf16.msra.mxu0 %v4468_v26  ;;  %3166 = vmatprep.subr.bf16.mxu1 %v4473_v27  ;;  %v4542_v26 = vld [vmem:[%s6635_s1 + $0x9a4] ss:$8 sps:$4 sm:$0xff]   ;;  %v4537_v27 = vld [vmem:[%s6635_s1 + $0x2a0] ss:$8 sps:$4 sm:$0xff]  }
  0x7d   :  { %3453 = vmatprep.subr.bf16.mxu0 %v4476_v28  ;;  %v4540_v28 = vld [vmem:[%s6635_s1 + $0x9a0] ss:$8 sps:$4 sm:$0xff]  }
  0x7f   :  { %3167 = vmatpush1.bf16.msra.mxu1 %v4471_v30  ;;  %v4545_v30 = vld [vmem:[%s6635_s1 + $0x2b4] ss:$8 sps:$4 sm:$0xff]  }
  0x80   :  { %3454 = vmatpush1.bf16.msra.mxu0 %v4474_v33  ;;  %3177 = vmatprep.subr.bf16.mxu1 %v4479_v34  ;;  %v4546_v33 = vld [vmem:[%s6635_s1 + $0x9b0] ss:$8 sps:$4 sm:$0xff]   ;;  %v4551_v34 = vld [vmem:[%s6635_s1 + $0x2c4] ss:$8 sps:$4 sm:$0xff]  }
  0x81   :  { %3464 = vmatprep.subr.bf16.mxu0 %v4482_v35  ;;  %v4554_v35 = vld [vmem:[%s6635_s1 + $0x9c4] ss:$8 sps:$4 sm:$0xff]  }
  0x82   :  { %3169 = vmatmul.mubr.bf16.vlgmr.msra.gmra.mrb[0].mxu1 %v175_v41  ;;  %v4560_v41 = vld [vmem:[%s6635_s1 + $0x9d4] ss:$8 sps:$4 sm:$0xff]  }
  0x83   :  { %3456 = vmatmul.mubr.bf16.vlgmr.msra.gmra.mrb[0].mxu0 %v189_v42  ;;  %3178 = vmatpush1.bf16.msra.mxu1 %v4477_v39  ;;  %v4557_v39 = vld [vmem:[%s6635_s1 + $0x2d4] ss:$8 sps:$4 sm:$0xff]   ;;  %v4555_v42 = vld [vmem:[%s6635_s1 + $0x2d0] ss:$8 sps:$4 sm:$0xff]  }
  0x84   :  { %3465 = vmatpush1.bf16.msra.mxu0 %v4480_v43  ;;  %3179 = vmatprep.subr.bf16.mxu1 %v4485_v44  ;;  %v4558_v43 = vld [vmem:[%s6635_s1 + $0x9d0] ss:$8 sps:$4 sm:$0xff]   ;;  %v4563_v44 = vld [vmem:[%s6635_s1 + $0x2e4] ss:$8 sps:$4 sm:$0xff]  }
  0x85   :  { %3466 = vmatprep.subr.bf16.mxu0 %v4488_v50  ;;  %3209 = vmatprep.mubr.bf16.mxu1 %v178_v45  ;;  %v4566_v50 = vld [vmem:[%s6635_s1 + $0x9e4] ss:$8 sps:$4 sm:$0xff]   ;;  %v4561_v45 = vld [vmem:[%s6635_s1 + $0x2e0] ss:$8 sps:$4 sm:$0xff]  }
  0x86   :  { %3496 = vmatprep.mubr.bf16.mxu0 %v192_v47  ;;  %v5672_v47 = vsub.s32 4, %v5173_v40 }
  0x87   :  { %3180 = vmatpush1.bf16.msra.mxu1 %v4483_v48  ;;  %v4564_v48 = vld [vmem:[%s6635_s1 + $0x9e0] ss:$8 sps:$4 sm:$0xff]  }
  0x88   :  { %3467 = vmatpush1.bf16.msra.mxu0 %v4486_v52  ;;  %3181 = vmatprep.subr.bf16.mxu1 %v4491_v53  ;;  %v4569_v52 = vld [vmem:[%s6635_s1 + $0x2f4] ss:$8 sps:$4 sm:$0xff]  }
  0x89   :  { %3468 = vmatprep.subr.bf16.mxu0 %v4494_v54  ;;  %v4572_v53 = vld [vmem:[%s6635_s1 + $0x9f4] ss:$8 sps:$4 sm:$0xff]   ;;  %v4567_v54 = vld [vmem:[%s6635_s1 + $0x2f0] ss:$8 sps:$4 sm:$0xff]  }
  0x8b   :  { %3182 = vmatpush1.bf16.msra.mxu1 %v4489_v55  ;;  %v5689_v55 = vld [vmem:[%s6634_s0] sm:$0xff] }
  0x8c   :  { %3469 = vmatpush1.bf16.msra.mxu0 %v4492_v56  ;;  %3183 = vmatprep.subr.bf16.mxu1 %v4497_v57  ;;  %v42_v56 = vrot.slane %v5689_v55, %v5672_v47  ;;  %v98_v57 = vrot.slane %v5365_v51, %v5466_v25 }
  0x8d   :  { %3470 = vmatprep.subr.bf16.mxu0 %v4500_v58  ;;  %v4570_v58 = vld [vmem:[%s6635_s1 + $0x9f0] ss:$8 sps:$4 sm:$0xff]  }
  0x8f   :  { %3184 = vmatpush1.bf16.msra.mxu1 %v4495_v59  ;;  %v4575_v59 = vld [vmem:[%s6635_s1 + $0x304] ss:$8 sps:$4 sm:$0xff]  }
  0x90   :  { %3471 = vmatpush1.bf16.msra.mxu0 %v4498_v60  ;;  %3185 = vmatprep.subr.bf16.mxu1 %v4503_v61  ;;  %v4578_v60 = vld [vmem:[%s6635_s1 + $0xa04] ss:$8 sps:$4 sm:$0xff]   ;;  %v54_v61 = vrot.slane %v5689_v55, %v5200_v49 }
  0x91   :  { %3472 = vmatprep.subr.bf16.mxu0 %v4506_v62  ;;  %v110_v62 = vrot.slane %v5365_v51, %v5478_v29  ;;  %v4584_v51 = vld [vmem:[%s6635_s1 + $0xa14] ss:$8 sps:$4 sm:$0xff]  }
  0x93   :  { %3186 = vmatpush1.bf16.msra.mxu1 %v4501_v63  ;;  %v4573_v63 = vld [vmem:[%s6635_s1 + $0x300] ss:$8 sps:$4 sm:$0xff]  }
  0x94   :  { %3473 = vmatpush1.bf16.msra.mxu0 %v4504_v0  ;;  %3187 = vmatprep.subr.bf16.mxu1 %v4509_v1  ;;  %v177_v0 = vpack.c.bf16 %v42_v56, %v42_v56  ;;  %v191_v1 = vpack.c.bf16 %v98_v57, %v98_v57  ;;  %v4641_v56 = vld [vmem:[%s6635_s1 + $0x3b4] ss:$8 sps:$4 sm:$0xff]  }
  0x95   :  { %3474 = vmatprep.subr.bf16.mxu0 %v4512_v2  ;;  %v4576_v2 = vld [vmem:[%s6635_s1 + $0xa00] ss:$8 sps:$4 sm:$0xff]   ;;  %v4644_v57 = vld [vmem:[%s6635_s1 + $0xab4] ss:$8 sps:$4 sm:$0xff]  }
  0x97   :  { %3188 = vmatpush1.bf16.msra.mxu1 %v4507_v3  ;;  %v4581_v3 = vld [vmem:[%s6635_s1 + $0x314] ss:$8 sps:$4 sm:$0xff]  }
  0x98   :  { %3475 = vmatpush1.bf16.msra.mxu0 %v4510_v6  ;;  %3189 = vmatprep.subr.bf16.mxu1 %v4515_v7  ;;  %v180_v6 = vpack.c.bf16 %v54_v61, %v54_v61  ;;  %v194_v7 = vpack.c.bf16 %v110_v62, %v110_v62  ;;  %v4650_v61 = vld [vmem:[%s6635_s1 + $0xac4] ss:$8 sps:$4 sm:$0xff]   ;;  %v4645_v62 = vld [vmem:[%s6635_s1 + $0x3c0] ss:$8 sps:$4 sm:$0xff]  }
  0x99   :  { %3476 = vmatprep.subr.bf16.mxu0 %v4518_v8  ;;  %v4579_v8 = vld [vmem:[%s6635_s1 + $0x310] ss:$8 sps:$4 sm:$0xff]  }
  0x9b   :  { %3190 = vmatpush1.bf16.msra.mxu1 %v4513_v9  ;;  %v4582_v9 = vld [vmem:[%s6635_s1 + $0xa10] ss:$8 sps:$4 sm:$0xff]  }
  0x9c   :  { %3477 = vmatpush1.bf16.msra.mxu0 %v4516_v11  ;;  %3191 = vmatprep.subr.bf16.mxu1 %v4521_v12  ;;  %v4587_v11 = vld [vmem:[%s6635_s1 + $0x324] ss:$8 sps:$4 sm:$0xff]  }
  0x9d   :  { %3478 = vmatprep.subr.bf16.mxu0 %v4524_v13  ;;  %v4590_v12 = vld [vmem:[%s6635_s1 + $0xa24] ss:$8 sps:$4 sm:$0xff]   ;;  %v4585_v13 = vld [vmem:[%s6635_s1 + $0x320] ss:$8 sps:$4 sm:$0xff]  }
  0x9f   :  { %3192 = vmatpush1.bf16.msra.mxu1 %v4519_v14  ;;  %v4588_v14 = vld [vmem:[%s6635_s1 + $0xa20] ss:$8 sps:$4 sm:$0xff]  }
  0xa0   :  { %3479 = vmatpush1.bf16.msra.mxu0 %v4522_v15  ;;  %3193 = vmatprep.subr.bf16.mxu1 %v4527_v16  ;;  %v4593_v15 = vld [vmem:[%s6635_s1 + $0x334] ss:$8 sps:$4 sm:$0xff]  }
  0xa1   :  { %3480 = vmatprep.subr.bf16.mxu0 %v4530_v17  ;;  %v4596_v16 = vld [vmem:[%s6635_s1 + $0xa34] ss:$8 sps:$4 sm:$0xff]   ;;  %v4591_v17 = vld [vmem:[%s6635_s1 + $0x330] ss:$8 sps:$4 sm:$0xff]  }
  0xa3   :  { %3194 = vmatpush1.bf16.msra.mxu1 %v4525_v18  ;;  %v4594_v18 = vld [vmem:[%s6635_s1 + $0xa30] ss:$8 sps:$4 sm:$0xff]  }
  0xa4   :  { %3481 = vmatpush1.bf16.msra.mxu0 %v4528_v19  ;;  %3195 = vmatprep.subr.bf16.mxu1 %v4533_v20  ;;  %v4599_v19 = vld [vmem:[%s6635_s1 + $0x344] ss:$8 sps:$4 sm:$0xff]  }
  0xa5   :  { %3482 = vmatprep.subr.bf16.mxu0 %v4536_v21  ;;  %v4602_v20 = vld [vmem:[%s6635_s1 + $0xa44] ss:$8 sps:$4 sm:$0xff]   ;;  %v4597_v21 = vld [vmem:[%s6635_s1 + $0x340] ss:$8 sps:$4 sm:$0xff]  }
  0xa7   :  { %3196 = vmatpush1.bf16.msra.mxu1 %v4531_v22  ;;  %v4600_v22 = vld [vmem:[%s6635_s1 + $0xa40] ss:$8 sps:$4 sm:$0xff]  }
  0xa8   :  { %3483 = vmatpush1.bf16.msra.mxu0 %v4534_v23  ;;  %3197 = vmatprep.subr.bf16.mxu1 %v4539_v24  ;;  %v4605_v23 = vld [vmem:[%s6635_s1 + $0x354] ss:$8 sps:$4 sm:$0xff]  }
  0xa9   :  { %3484 = vmatprep.subr.bf16.mxu0 %v4542_v26  ;;  %v4608_v24 = vld [vmem:[%s6635_s1 + $0xa54] ss:$8 sps:$4 sm:$0xff]   ;;  %v4603_v26 = vld [vmem:[%s6635_s1 + $0x350] ss:$8 sps:$4 sm:$0xff]  }
  0xab   :  { %3198 = vmatpush1.bf16.msra.mxu1 %v4537_v27  ;;  %v4606_v27 = vld [vmem:[%s6635_s1 + $0xa50] ss:$8 sps:$4 sm:$0xff]  }
  0xac   :  { %3485 = vmatpush1.bf16.msra.mxu0 %v4540_v28  ;;  %3199 = vmatprep.subr.bf16.mxu1 %v4545_v30  ;;  %v4611_v28 = vld [vmem:[%s6635_s1 + $0x364] ss:$8 sps:$4 sm:$0xff]  }
  0xad   :  { %3486 = vmatprep.subr.bf16.mxu0 %v4548_v31  ;;  %v4614_v30 = vld [vmem:[%s6635_s1 + $0xa64] ss:$8 sps:$4 sm:$0xff]   ;;  %v4609_v31 = vld [vmem:[%s6635_s1 + $0x360] ss:$8 sps:$4 sm:$0xff]  }
  0xaf   :  { %3200 = vmatpush1.bf16.msra.mxu1 %v4543_v32  ;;  %v4612_v32 = vld [vmem:[%s6635_s1 + $0xa60] ss:$8 sps:$4 sm:$0xff]  }
  0xb0   :  { %3487 = vmatpush1.bf16.msra.mxu0 %v4546_v33  ;;  %3201 = vmatprep.subr.bf16.mxu1 %v4551_v34  ;;  %v4617_v33 = vld [vmem:[%s6635_s1 + $0x374] ss:$8 sps:$4 sm:$0xff]  }
  0xb1   :  { %3488 = vmatprep.subr.bf16.mxu0 %v4554_v35  ;;  %v4620_v34 = vld [vmem:[%s6635_s1 + $0xa74] ss:$8 sps:$4 sm:$0xff]   ;;  %v4615_v35 = vld [vmem:[%s6635_s1 + $0x370] ss:$8 sps:$4 sm:$0xff]  }
  0xb3   :  { %3202 = vmatpush1.bf16.msra.mxu1 %v4549_v37  ;;  %v4618_v37 = vld [vmem:[%s6635_s1 + $0xa70] ss:$8 sps:$4 sm:$0xff]  }
  0xb4   :  { %3489 = vmatpush1.bf16.msra.mxu0 %v4552_v38  ;;  %3203 = vmatprep.subr.bf16.mxu1 %v4557_v39  ;;  %v4623_v38 = vld [vmem:[%s6635_s1 + $0x384] ss:$8 sps:$4 sm:$0xff]  }
  0xb5   :  { %3490 = vmatprep.subr.bf16.mxu0 %v4560_v41  ;;  %v4626_v39 = vld [vmem:[%s6635_s1 + $0xa84] ss:$8 sps:$4 sm:$0xff]   ;;  %v4621_v41 = vld [vmem:[%s6635_s1 + $0x380] ss:$8 sps:$4 sm:$0xff]  }
  0xb7   :  { %3204 = vmatpush1.bf16.msra.mxu1 %v4555_v42  ;;  %v4624_v42 = vld [vmem:[%s6635_s1 + $0xa80] ss:$8 sps:$4 sm:$0xff]  }
  0xb8   :  { %3491 = vmatpush1.bf16.msra.mxu0 %v4558_v43  ;;  %3205 = vmatprep.subr.bf16.mxu1 %v4563_v44  ;;  %v4629_v43 = vld [vmem:[%s6635_s1 + $0x394] ss:$8 sps:$4 sm:$0xff]  }
  0xb9   :  { %3492 = vmatprep.subr.bf16.mxu0 %v4566_v50  ;;  %v4632_v44 = vld [vmem:[%s6635_s1 + $0xa94] ss:$8 sps:$4 sm:$0xff]   ;;  %v4627_v50 = vld [vmem:[%s6635_s1 + $0x390] ss:$8 sps:$4 sm:$0xff]  }
  0xbb   :  { %3206 = vmatpush1.bf16.msra.mxu1 %v4561_v45  ;;  %v4630_v45 = vld [vmem:[%s6635_s1 + $0xa90] ss:$8 sps:$4 sm:$0xff]  }
  0xbc   :  { %3493 = vmatpush1.bf16.msra.mxu0 %v4564_v48  ;;  %3207 = vmatprep.subr.bf16.mxu1 %v4569_v52  ;;  %v4635_v48 = vld [vmem:[%s6635_s1 + $0x3a4] ss:$8 sps:$4 sm:$0xff]  }
  0xbd   :  { %3494 = vmatprep.subr.bf16.mxu0 %v4572_v53  ;;  %v4638_v52 = vld [vmem:[%s6635_s1 + $0xaa4] ss:$8 sps:$4 sm:$0xff]   ;;  %v4633_v53 = vld [vmem:[%s6635_s1 + $0x3a0] ss:$8 sps:$4 sm:$0xff]  }
  0xbf   :  { %3208 = vmatpush1.bf16.msra.mxu1 %v4567_v54  ;;  %v4636_v54 = vld [vmem:[%s6635_s1 + $0xaa0] ss:$8 sps:$4 sm:$0xff]  }
  0xc0   :  { %3495 = vmatpush1.bf16.msra.mxu0 %v4570_v58  ;;  %3218 = vmatprep.subr.bf16.mxu1 %v4575_v59  ;;  %v4639_v58 = vld [vmem:[%s6635_s1 + $0x3b0] ss:$8 sps:$4 sm:$0xff]  }
  0xc1   :  { %3505 = vmatprep.subr.bf16.mxu0 %v4578_v60  ;;  %v4642_v59 = vld [vmem:[%s6635_s1 + $0xab0] ss:$8 sps:$4 sm:$0xff]   ;;  %v4647_v60 = vld [vmem:[%s6635_s1 + $0x3c4] ss:$8 sps:$4 sm:$0xff]  }
  0xc2   :  { %3210 = vmatmul.mubr.bf16.vlgmr.msra.gmra.mrb[0].mxu1 %v177_v0  ;;  %v4653_v0 = vld [vmem:[%s6635_s1 + $0x3d4] ss:$8 sps:$4 sm:$0xff]  }
  0xc3   :  { %3497 = vmatmul.mubr.bf16.vlgmr.msra.gmra.mrb[0].mxu0 %v191_v1  ;;  %3219 = vmatpush1.bf16.msra.mxu1 %v4573_v63  ;;  %v4648_v63 = vld [vmem:[%s6635_s1 + $0xac0] ss:$8 sps:$4 sm:$0xff]   ;;  %v4656_v1 = vld [vmem:[%s6635_s1 + $0xad4] ss:$8 sps:$4 sm:$0xff]  }
  0xc4   :  { %3506 = vmatpush1.bf16.msra.mxu0 %v4576_v2  ;;  %3220 = vmatprep.subr.bf16.mxu1 %v4581_v3  ;;  %v4651_v2 = vld [vmem:[%s6635_s1 + $0x3d0] ss:$8 sps:$4 sm:$0xff]  }
  0xc5   :  { %3507 = vmatprep.subr.bf16.mxu0 %v4584_v51  ;;  %3250 = vmatprep.mubr.bf16.mxu1 %v180_v6  ;;  %v4654_v3 = vld [vmem:[%s6635_s1 + $0xad0] ss:$8 sps:$4 sm:$0xff]   ;;  %v4659_v51 = vld [vmem:[%s6635_s1 + $0x3e4] ss:$8 sps:$4 sm:$0xff]  }
  0xc6   :  { %3537 = vmatprep.mubr.bf16.mxu0 %v194_v7  ;;  %v4662_v6 = vld [vmem:[%s6635_s1 + $0xae4] ss:$8 sps:$4 sm:$0xff]   ;;  %v4657_v7 = vld [vmem:[%s6635_s1 + $0x3e0] ss:$8 sps:$4 sm:$0xff]  }
  0xc7   :  { %3221 = vmatpush1.bf16.msra.mxu1 %v4579_v8  ;;  %v4660_v8 = vld [vmem:[%s6635_s1 + $0xae0] ss:$8 sps:$4 sm:$0xff]  }
  0xc8   :  { %3508 = vmatpush1.bf16.msra.mxu0 %v4582_v9  ;;  %3222 = vmatprep.subr.bf16.mxu1 %v4587_v11  ;;  %v4665_v9 = vld [vmem:[%s6635_s1 + $0x3f4] ss:$8 sps:$4 sm:$0xff]  }
  0xc9   :  { %3509 = vmatprep.subr.bf16.mxu0 %v4590_v12  ;;  %v4668_v11 = vld [vmem:[%s6635_s1 + $0xaf4] ss:$8 sps:$4 sm:$0xff]   ;;  %v4663_v12 = vld [vmem:[%s6635_s1 + $0x3f0] ss:$8 sps:$4 sm:$0xff]  }
  0xcb   :  { %3223 = vmatpush1.bf16.msra.mxu1 %v4585_v13  ;;  %v50_v13 = vrot.slane %v5689_v55, %v5253_v5  ;;  %v4674_v55 = vld [vmem:[%s6635_s1 + $0xb04] ss:$8 sps:$4 sm:$0xff]  }
  0xcc   :  { %3510 = vmatpush1.bf16.msra.mxu0 %v4588_v14  ;;  %3224 = vmatprep.subr.bf16.mxu1 %v4593_v15  ;;  %v5896_v14 = vld [vmem:[%s6634_s0 + $0x10] sm:$0xff] }
  0xcd   :  { %3511 = vmatprep.subr.bf16.mxu0 %v4596_v16  ;;  %v106_v15 = vrot.slane %v5896_v14, %v5672_v47  ;;  %v4666_v16 = vld [vmem:[%s6635_s1 + $0xaf0] ss:$8 sps:$4 sm:$0xff]  }
  0xcf   :  { %3225 = vmatpush1.bf16.msra.mxu1 %v4591_v17  ;;  %v4671_v17 = vld [vmem:[%s6635_s1 + $0x404] ss:$8 sps:$4 sm:$0xff]  }
  0xd0   :  { %3512 = vmatpush1.bf16.msra.mxu0 %v4594_v18  ;;  %3226 = vmatprep.subr.bf16.mxu1 %v4599_v19  ;;  %v5912_v18 = vld [vmem:[%s6634_s0 + $0x8] sm:$0xff] }
  0xd1   :  { %3513 = vmatprep.subr.bf16.mxu0 %v4602_v20  ;;  %v62_v19 = vrot.slane %v5912_v18, %v5191_v46  ;;  %v118_v20 = vrot.slane %v5896_v14, %v5200_v49  ;;  %v4680_v49 = vld [vmem:[%s6635_s1 + $0xb14] ss:$8 sps:$4 sm:$0xff]  }
  0xd3   :  { %3227 = vmatpush1.bf16.msra.mxu1 %v4597_v21  ;;  %v4669_v21 = vld [vmem:[%s6635_s1 + $0x400] ss:$8 sps:$4 sm:$0xff]  }
  0xd4   :  { %3514 = vmatpush1.bf16.msra.mxu0 %v4600_v22  ;;  %3228 = vmatprep.subr.bf16.mxu1 %v4605_v23  ;;  %v179_v22 = vpack.c.bf16 %v50_v13, %v50_v13  ;;  %v193_v23 = vpack.c.bf16 %v106_v15, %v106_v15  ;;  %v4737_v13 = vld [vmem:[%s6635_s1 + $0x4b4] ss:$8 sps:$4 sm:$0xff]  }
  0xd5   :  { %3515 = vmatprep.subr.bf16.mxu0 %v4608_v24  ;;  %v4672_v24 = vld [vmem:[%s6635_s1 + $0xb00] ss:$8 sps:$4 sm:$0xff]   ;;  %v4740_v15 = vld [vmem:[%s6635_s1 + $0xbb4] ss:$8 sps:$4 sm:$0xff]  }
  0xd7   :  { %3229 = vmatpush1.bf16.msra.mxu1 %v4603_v26  ;;  %v4677_v26 = vld [vmem:[%s6635_s1 + $0x414] ss:$8 sps:$4 sm:$0xff]  }
  0xd8   :  { %3516 = vmatpush1.bf16.msra.mxu0 %v4606_v27  ;;  %3230 = vmatprep.subr.bf16.mxu1 %v4611_v28  ;;  %v182_v27 = vpack.c.bf16 %v62_v19, %v62_v19  ;;  %v196_v28 = vpack.c.bf16 %v118_v20, %v118_v20  ;;  %v4746_v19 = vld [vmem:[%s6635_s1 + $0xbc4] ss:$8 sps:$4 sm:$0xff]   ;;  %v4741_v20 = vld [vmem:[%s6635_s1 + $0x4c0] ss:$8 sps:$4 sm:$0xff]  }
  0xd9   :  { %3517 = vmatprep.subr.bf16.mxu0 %v4614_v30  ;;  %v4675_v30 = vld [vmem:[%s6635_s1 + $0x410] ss:$8 sps:$4 sm:$0xff]  }
  0xdb   :  { %3231 = vmatpush1.bf16.msra.mxu1 %v4609_v31  ;;  %v4678_v31 = vld [vmem:[%s6635_s1 + $0xb10] ss:$8 sps:$4 sm:$0xff]  }
  0xdc   :  { %3518 = vmatpush1.bf16.msra.mxu0 %v4612_v32  ;;  %3232 = vmatprep.subr.bf16.mxu1 %v4617_v33  ;;  %v4683_v32 = vld [vmem:[%s6635_s1 + $0x424] ss:$8 sps:$4 sm:$0xff]  }
  0xdd   :  { %3519 = vmatprep.subr.bf16.mxu0 %v4620_v34  ;;  %v4686_v33 = vld [vmem:[%s6635_s1 + $0xb24] ss:$8 sps:$4 sm:$0xff]   ;;  %v4681_v34 = vld [vmem:[%s6635_s1 + $0x420] ss:$8 sps:$4 sm:$0xff]  }
  0xdf   :  { %3233 = vmatpush1.bf16.msra.mxu1 %v4615_v35  ;;  %v4684_v35 = vld [vmem:[%s6635_s1 + $0xb20] ss:$8 sps:$4 sm:$0xff]  }
  0xe0   :  { %3520 = vmatpush1.bf16.msra.mxu0 %v4618_v37  ;;  %3234 = vmatprep.subr.bf16.mxu1 %v4623_v38  ;;  %v4689_v37 = vld [vmem:[%s6635_s1 + $0x434] ss:$8 sps:$4 sm:$0xff]  }
  0xe1   :  { %3521 = vmatprep.subr.bf16.mxu0 %v4626_v39  ;;  %v4692_v38 = vld [vmem:[%s6635_s1 + $0xb34] ss:$8 sps:$4 sm:$0xff]   ;;  %v4687_v39 = vld [vmem:[%s6635_s1 + $0x430] ss:$8 sps:$4 sm:$0xff]  }
  0xe3   :  { %3235 = vmatpush1.bf16.msra.mxu1 %v4621_v41  ;;  %v4690_v41 = vld [vmem:[%s6635_s1 + $0xb30] ss:$8 sps:$4 sm:$0xff]  }
  0xe4   :  { %3522 = vmatpush1.bf16.msra.mxu0 %v4624_v42  ;;  %3236 = vmatprep.subr.bf16.mxu1 %v4629_v43  ;;  %v4695_v42 = vld [vmem:[%s6635_s1 + $0x444] ss:$8 sps:$4 sm:$0xff]  }
  0xe5   :  { %3523 = vmatprep.subr.bf16.mxu0 %v4632_v44  ;;  %v4698_v43 = vld [vmem:[%s6635_s1 + $0xb44] ss:$8 sps:$4 sm:$0xff]   ;;  %v4693_v44 = vld [vmem:[%s6635_s1 + $0x440] ss:$8 sps:$4 sm:$0xff]  }
  0xe7   :  { %3237 = vmatpush1.bf16.msra.mxu1 %v4627_v50  ;;  %v4696_v50 = vld [vmem:[%s6635_s1 + $0xb40] ss:$8 sps:$4 sm:$0xff]  }
  0xe8   :  { %3524 = vmatpush1.bf16.msra.mxu0 %v4630_v45  ;;  %3238 = vmatprep.subr.bf16.mxu1 %v4635_v48  ;;  %v4701_v45 = vld [vmem:[%s6635_s1 + $0x454] ss:$8 sps:$4 sm:$0xff]  }
  0xe9   :  { %3525 = vmatprep.subr.bf16.mxu0 %v4638_v52  ;;  %v4704_v48 = vld [vmem:[%s6635_s1 + $0xb54] ss:$8 sps:$4 sm:$0xff]   ;;  %v4699_v52 = vld [vmem:[%s6635_s1 + $0x450] ss:$8 sps:$4 sm:$0xff]  }
  0xeb   :  { %3239 = vmatpush1.bf16.msra.mxu1 %v4633_v53  ;;  %v4702_v53 = vld [vmem:[%s6635_s1 + $0xb50] ss:$8 sps:$4 sm:$0xff]  }
  0xec   :  { %3526 = vmatpush1.bf16.msra.mxu0 %v4636_v54  ;;  %3240 = vmatprep.subr.bf16.mxu1 %v4641_v56  ;;  %v4707_v54 = vld [vmem:[%s6635_s1 + $0x464] ss:$8 sps:$4 sm:$0xff]  }
  0xed   :  { %3527 = vmatprep.subr.bf16.mxu0 %v4644_v57  ;;  %v4710_v56 = vld [vmem:[%s6635_s1 + $0xb64] ss:$8 sps:$4 sm:$0xff]   ;;  %v4705_v57 = vld [vmem:[%s6635_s1 + $0x460] ss:$8 sps:$4 sm:$0xff]  }
  0xef   :  { %3241 = vmatpush1.bf16.msra.mxu1 %v4639_v58  ;;  %v4708_v58 = vld [vmem:[%s6635_s1 + $0xb60] ss:$8 sps:$4 sm:$0xff]  }
  0xf0   :  { %3528 = vmatpush1.bf16.msra.mxu0 %v4642_v59  ;;  %3242 = vmatprep.subr.bf16.mxu1 %v4647_v60  ;;  %v4713_v59 = vld [vmem:[%s6635_s1 + $0x474] ss:$8 sps:$4 sm:$0xff]  }
  0xf1   :  { %3529 = vmatprep.subr.bf16.mxu0 %v4650_v61  ;;  %v4716_v60 = vld [vmem:[%s6635_s1 + $0xb74] ss:$8 sps:$4 sm:$0xff]   ;;  %v4711_v61 = vld [vmem:[%s6635_s1 + $0x470] ss:$8 sps:$4 sm:$0xff]  }
  0xf3   :  { %3243 = vmatpush1.bf16.msra.mxu1 %v4645_v62  ;;  %v4714_v62 = vld [vmem:[%s6635_s1 + $0xb70] ss:$8 sps:$4 sm:$0xff]  }
  0xf4   :  { %3530 = vmatpush1.bf16.msra.mxu0 %v4648_v63  ;;  %3244 = vmatprep.subr.bf16.mxu1 %v4653_v0  ;;  %v4719_v63 = vld [vmem:[%s6635_s1 + $0x484] ss:$8 sps:$4 sm:$0xff]  }
  0xf5   :  { %3531 = vmatprep.subr.bf16.mxu0 %v4656_v1  ;;  %v4722_v0 = vld [vmem:[%s6635_s1 + $0xb84] ss:$8 sps:$4 sm:$0xff]   ;;  %v4717_v1 = vld [vmem:[%s6635_s1 + $0x480] ss:$8 sps:$4 sm:$0xff]  }
  0xf7   :  { %3245 = vmatpush1.bf16.msra.mxu1 %v4651_v2  ;;  %v4720_v2 = vld [vmem:[%s6635_s1 + $0xb80] ss:$8 sps:$4 sm:$0xff]  }
  0xf8   :  { %3532 = vmatpush1.bf16.msra.mxu0 %v4654_v3  ;;  %3246 = vmatprep.subr.bf16.mxu1 %v4659_v51  ;;  %v4725_v3 = vld [vmem:[%s6635_s1 + $0x494] ss:$8 sps:$4 sm:$0xff]  }
  0xf9   :  { %3533 = vmatprep.subr.bf16.mxu0 %v4662_v6  ;;  %v4728_v51 = vld [vmem:[%s6635_s1 + $0xb94] ss:$8 sps:$4 sm:$0xff]   ;;  %v4723_v6 = vld [vmem:[%s6635_s1 + $0x490] ss:$8 sps:$4 sm:$0xff]  }
  0xfb   :  { %3247 = vmatpush1.bf16.msra.mxu1 %v4657_v7  ;;  %v4726_v7 = vld [vmem:[%s6635_s1 + $0xb90] ss:$8 sps:$4 sm:$0xff]  }
  0xfc   :  { %3534 = vmatpush1.bf16.msra.mxu0 %v4660_v8  ;;  %3248 = vmatprep.subr.bf16.mxu1 %v4665_v9  ;;  %v4731_v8 = vld [vmem:[%s6635_s1 + $0x4a4] ss:$8 sps:$4 sm:$0xff]  }
  0xfd   :  { %3535 = vmatprep.subr.bf16.mxu0 %v4668_v11  ;;  %v4734_v9 = vld [vmem:[%s6635_s1 + $0xba4] ss:$8 sps:$4 sm:$0xff]   ;;  %v4729_v11 = vld [vmem:[%s6635_s1 + $0x4a0] ss:$8 sps:$4 sm:$0xff]  }
  0xff   :  { %3249 = vmatpush1.bf16.msra.mxu1 %v4663_v12  ;;  %v4732_v12 = vld [vmem:[%s6635_s1 + $0xba0] ss:$8 sps:$4 sm:$0xff]  }
 0x100   :  { %3536 = vmatpush1.bf16.msra.mxu0 %v4666_v16  ;;  %3259 = vmatprep.subr.bf16.mxu1 %v4671_v17  ;;  %v4735_v16 = vld [vmem:[%s6635_s1 + $0x4b0] ss:$8 sps:$4 sm:$0xff]  }
 0x101   :  { %3546 = vmatprep.subr.bf16.mxu0 %v4674_v55  ;;  %v4738_v17 = vld [vmem:[%s6635_s1 + $0xbb0] ss:$8 sps:$4 sm:$0xff]   ;;  %v4743_v55 = vld [vmem:[%s6635_s1 + $0x4c4] ss:$8 sps:$4 sm:$0xff]  }
 0x102   :  { %3251 = vmatmul.mubr.bf16.vlgmr.msra.gmra.mrb[0].mxu1 %v179_v22  ;;  %v4749_v22 = vld [vmem:[%s6635_s1 + $0x4d4] ss:$8 sps:$4 sm:$0xff]  }
 0x103   :  { %3538 = vmatmul.mubr.bf16.vlgmr.msra.gmra.mrb[0].mxu0 %v193_v23  ;;  %3260 = vmatpush1.bf16.msra.mxu1 %v4669_v21  ;;  %v4744_v21 = vld [vmem:[%s6635_s1 + $0xbc0] ss:$8 sps:$4 sm:$0xff]   ;;  %v4752_v23 = vld [vmem:[%s6635_s1 + $0xbd4] ss:$8 sps:$4 sm:$0xff]  }
 0x104   :  { %3547 = vmatpush1.bf16.msra.mxu0 %v4672_v24  ;;  %3261 = vmatprep.subr.bf16.mxu1 %v4677_v26 }
 0x105   :  { %3548 = vmatprep.subr.bf16.mxu0 %v4680_v49  ;;  %3291 = vmatprep.mubr.bf16.mxu1 %v182_v27 }
 0x106   :  { %3578 = vmatprep.mubr.bf16.mxu0 %v196_v28 }
 0x107   :  { %3262 = vmatpush1.bf16.msra.mxu1 %v4675_v30 }
 0x108   :  { %3549 = vmatpush1.bf16.msra.mxu0 %v4678_v31  ;;  %3263 = vmatprep.subr.bf16.mxu1 %v4683_v32 }
 0x109   :  { %3550 = vmatprep.subr.bf16.mxu0 %v4686_v33 }
 0x10b   :  { %3264 = vmatpush1.bf16.msra.mxu1 %v4681_v34 }
 0x10c   :  { %3551 = vmatpush1.bf16.msra.mxu0 %v4684_v35  ;;  %3265 = vmatprep.subr.bf16.mxu1 %v4689_v37 }
 0x10d   :  { %3552 = vmatprep.subr.bf16.mxu0 %v4692_v38 }
 0x10f   :  { %3266 = vmatpush1.bf16.msra.mxu1 %v4687_v39 }
 0x110   :  { %3553 = vmatpush1.bf16.msra.mxu0 %v4690_v41  ;;  %3267 = vmatprep.subr.bf16.mxu1 %v4695_v42 }
 0x111   :  { %3554 = vmatprep.subr.bf16.mxu0 %v4698_v43 }
 0x113   :  { %3268 = vmatpush1.bf16.msra.mxu1 %v4693_v44 }
 0x114   :  { %3555 = vmatpush1.bf16.msra.mxu0 %v4696_v50  ;;  %3269 = vmatprep.subr.bf16.mxu1 %v4701_v45 }
 0x115   :  { %3556 = vmatprep.subr.bf16.mxu0 %v4704_v48 }
 0x117   :  { %3270 = vmatpush1.bf16.msra.mxu1 %v4699_v52 }
 0x118   :  { %3557 = vmatpush1.bf16.msra.mxu0 %v4702_v53  ;;  %3271 = vmatprep.subr.bf16.mxu1 %v4707_v54 }
 0x119   :  { %3558 = vmatprep.subr.bf16.mxu0 %v4710_v56 }
 0x11b   :  { %3272 = vmatpush1.bf16.msra.mxu1 %v4705_v57 }
 0x11c   :  { %3559 = vmatpush1.bf16.msra.mxu0 %v4708_v58  ;;  %3273 = vmatprep.subr.bf16.mxu1 %v4713_v59 }
 0x11d   :  { %3560 = vmatprep.subr.bf16.mxu0 %v4716_v60 }
 0x11f   :  { %3274 = vmatpush1.bf16.msra.mxu1 %v4711_v61 }
 0x120   :  { %3561 = vmatpush1.bf16.msra.mxu0 %v4714_v62  ;;  %3275 = vmatprep.subr.bf16.mxu1 %v4719_v63 }
 0x121   :  { %3562 = vmatprep.subr.bf16.mxu0 %v4722_v0 }
 0x123   :  { %3276 = vmatpush1.bf16.msra.mxu1 %v4717_v1 }
 0x124   :  { %3563 = vmatpush1.bf16.msra.mxu0 %v4720_v2  ;;  %3277 = vmatprep.subr.bf16.mxu1 %v4725_v3 }
 0x125   :  { %3564 = vmatprep.subr.bf16.mxu0 %v4728_v51 }
 0x127   :  { %3278 = vmatpush1.bf16.msra.mxu1 %v4723_v6 }
 0x128   :  { %3565 = vmatpush1.bf16.msra.mxu0 %v4726_v7  ;;  %3279 = vmatprep.subr.bf16.mxu1 %v4731_v8 }
 0x129   :  { %3566 = vmatprep.subr.bf16.mxu0 %v4734_v9 }
 0x12b   :  { %3280 = vmatpush1.bf16.msra.mxu1 %v4729_v11 }
 0x12c   :  { %3567 = vmatpush1.bf16.msra.mxu0 %v4732_v12  ;;  %3281 = vmatprep.subr.bf16.mxu1 %v4737_v13 }
 0x12d   :  { %3568 = vmatprep.subr.bf16.mxu0 %v4740_v15 }
 0x12f   :  { %3282 = vmatpush1.bf16.msra.mxu1 %v4735_v16 }
 0x130   :  { %3569 = vmatpush1.bf16.msra.mxu0 %v4738_v17  ;;  %3283 = vmatprep.subr.bf16.mxu1 %v4743_v55 }
 0x131   :  { %3570 = vmatprep.subr.bf16.mxu0 %v4746_v19 }
 0x132   :  { %8 = vsyncpa [#allocation3], 0  ;;  %v4747_v24 = vld [vmem:[%s6635_s1 + $0x4d0] ss:$8 sps:$4 sm:$0xff]   ;;  %v4755_v49 = vld [vmem:[%s6635_s1 + $0x4e4] ss:$8 sps:$4 sm:$0xff]   ;;  %v58_v33 = vrot.slane %v5912_v18, %v5250_v4  ;;  %v114_v34 = vrot.slane %v5896_v14, %v5253_v5  ;;  %v70_v39 = vrot.slane %v5912_v18, %v5268_v10 }
 0x133   :  { %3284 = vmatpush1.bf16.msra.mxu1 %v4741_v20  ;;  %v4750_v26 = vld [vmem:[%s6635_s1 + $0xbd0] ss:$8 sps:$4 sm:$0xff]   ;;  %v4758_v27 = vld [vmem:[%s6635_s1 + $0xbe4] ss:$8 sps:$4 sm:$0xff]   ;;  %v4753_v28 = vld [vmem:[%s6635_s1 + $0x4e0] ss:$8 sps:$4 sm:$0xff]  }
 0x134   :  { %3571 = vmatpush1.bf16.msra.mxu0 %v4744_v21  ;;  %3285 = vmatprep.subr.bf16.mxu1 %v4749_v22  ;;  %v4756_v30 = vld [vmem:[%s6635_s1 + $0xbe0] ss:$8 sps:$4 sm:$0xff]   ;;  %v4761_v31 = vld [vmem:[%s6635_s1 + $0x4f4] ss:$8 sps:$4 sm:$0xff]   ;;  %v4759_v37 = vld [vmem:[%s6635_s1 + $0x4f0] ss:$8 sps:$4 sm:$0xff]   ;;  %v181_v42 = vpack.c.bf16 %v58_v33, %v58_v33  ;;  %v195_v43 = vpack.c.bf16 %v114_v34, %v114_v34  ;;  %v184_v52 = vpack.c.bf16 %v70_v39, %v70_v39 }
 0x135   :  { %3572 = vmatprep.subr.bf16.mxu0 %v4752_v23  ;;  %v4764_v32 = vld [vmem:[%s6635_s1 + $0xbf4] ss:$8 sps:$4 sm:$0xff]   ;;  %v4762_v38 = vld [vmem:[%s6635_s1 + $0xbf0] ss:$8 sps:$4 sm:$0xff]   ;;  %v4767_v5 = vld [vmem:[%s6635_s1 + $0x504] ss:$8 sps:$4 sm:$0xff]  }
 0x136   :  { %v6105_v35 = vld [vmem:[%s6634_s0 + $0x18] sm:$0x3f]  ;;  %v4770_v14 = vld [vmem:[%s6635_s1 + $0xc04] ss:$8 sps:$4 sm:$0xff]   ;;  %v4765_v44 = vld [vmem:[%s6635_s1 + $0x500] ss:$8 sps:$4 sm:$0xff]  }
 0x137   :  { %3286 = vmatpush1.bf16.msra.mxu1 %v4747_v24  ;;  %v126_v41 = vrot.slane %v6105_v35, %v5191_v46  ;;  %v4768_v50 = vld [vmem:[%s6635_s1 + $0xc00] ss:$8 sps:$4 sm:$0xff]   ;;  %v4773_v45 = vld [vmem:[%s6635_s1 + $0x514] ss:$8 sps:$4 sm:$0xff]   ;;  %v4771_v54 = vld [vmem:[%s6635_s1 + $0x510] ss:$8 sps:$4 sm:$0xff]  }
 0x138   :  { %3573 = vmatpush1.bf16.msra.mxu0 %v4750_v26  ;;  %3287 = vmatprep.subr.bf16.mxu1 %v4755_v49  ;;  %v4776_v48 = vld [vmem:[%s6635_s1 + $0xc14] ss:$8 sps:$4 sm:$0xff]   ;;  %v4774_v56 = vld [vmem:[%s6635_s1 + $0xc10] ss:$8 sps:$4 sm:$0xff]   ;;  %v4779_v57 = vld [vmem:[%s6635_s1 + $0x524] ss:$8 sps:$4 sm:$0xff]  }
 0x139   :  { %3574 = vmatprep.subr.bf16.mxu0 %v4758_v27  ;;  %v198_v53 = vpack.c.bf16 %v126_v41, %v126_v41  ;;  %v4782_v58 = vld [vmem:[%s6635_s1 + $0xc24] ss:$8 sps:$4 sm:$0xff]   ;;  %v4777_v59 = vld [vmem:[%s6635_s1 + $0x520] ss:$8 sps:$4 sm:$0xff]   ;;  %v4785_v61 = vld [vmem:[%s6635_s1 + $0x534] ss:$8 sps:$4 sm:$0xff]  }
 0x13a   :  { %v4780_v60 = vld [vmem:[%s6635_s1 + $0xc20] ss:$8 sps:$4 sm:$0xff]   ;;  %v4788_v62 = vld [vmem:[%s6635_s1 + $0xc34] ss:$8 sps:$4 sm:$0xff]   ;;  %v4783_v63 = vld [vmem:[%s6635_s1 + $0x530] ss:$8 sps:$4 sm:$0xff]  }
 0x13b   :  { %3288 = vmatpush1.bf16.msra.mxu1 %v4753_v28  ;;  %v4786_v0 = vld [vmem:[%s6635_s1 + $0xc30] ss:$8 sps:$4 sm:$0xff]   ;;  %v4791_v1 = vld [vmem:[%s6635_s1 + $0x544] ss:$8 sps:$4 sm:$0xff]   ;;  %v4789_v3 = vld [vmem:[%s6635_s1 + $0x540] ss:$8 sps:$4 sm:$0xff]  }
 0x13c   :  { %3575 = vmatpush1.bf16.msra.mxu0 %v4756_v30  ;;  %3289 = vmatprep.subr.bf16.mxu1 %v4761_v31  ;;  %v4794_v2 = vld [vmem:[%s6635_s1 + $0xc44] ss:$8 sps:$4 sm:$0xff]   ;;  %v4792_v51 = vld [vmem:[%s6635_s1 + $0xc40] ss:$8 sps:$4 sm:$0xff]   ;;  %v4797_v6 = vld [vmem:[%s6635_s1 + $0x554] ss:$8 sps:$4 sm:$0xff]  }
 0x13d   :  { %3576 = vmatprep.subr.bf16.mxu0 %v4764_v32  ;;  %v4800_v7 = vld [vmem:[%s6635_s1 + $0xc54] ss:$8 sps:$4 sm:$0xff]   ;;  %v4795_v8 = vld [vmem:[%s6635_s1 + $0x550] ss:$8 sps:$4 sm:$0xff]   ;;  %v4803_v11 = vld [vmem:[%s6635_s1 + $0x564] ss:$8 sps:$4 sm:$0xff]  }
 0x13e   :  { %v4798_v9 = vld [vmem:[%s6635_s1 + $0xc50] ss:$8 sps:$4 sm:$0xff]   ;;  %v4806_v12 = vld [vmem:[%s6635_s1 + $0xc64] ss:$8 sps:$4 sm:$0xff]   ;;  %v4801_v13 = vld [vmem:[%s6635_s1 + $0x560] ss:$8 sps:$4 sm:$0xff]  }
 0x13f   :  { %3290 = vmatpush1.bf16.msra.mxu1 %v4759_v37  ;;  %v4804_v15 = vld [vmem:[%s6635_s1 + $0xc60] ss:$8 sps:$4 sm:$0xff]   ;;  %v4809_v16 = vld [vmem:[%s6635_s1 + $0x574] ss:$8 sps:$4 sm:$0xff]   ;;  %v4807_v55 = vld [vmem:[%s6635_s1 + $0x570] ss:$8 sps:$4 sm:$0xff]  }
 0x140   :  { %3577 = vmatpush1.bf16.msra.mxu0 %v4762_v38  ;;  %3300 = vmatprep.subr.bf16.mxu1 %v4767_v5  ;;  %v4812_v17 = vld [vmem:[%s6635_s1 + $0xc74] ss:$8 sps:$4 sm:$0xff]   ;;  %v4810_v19 = vld [vmem:[%s6635_s1 + $0xc70] ss:$8 sps:$4 sm:$0xff]   ;;  %v4815_v20 = vld [vmem:[%s6635_s1 + $0x584] ss:$8 sps:$4 sm:$0xff]  }
 0x141   :  { %3587 = vmatprep.subr.bf16.mxu0 %v4770_v14  ;;  %v4818_v21 = vld [vmem:[%s6635_s1 + $0xc84] ss:$8 sps:$4 sm:$0xff]   ;;  %v4813_v22 = vld [vmem:[%s6635_s1 + $0x580] ss:$8 sps:$4 sm:$0xff]   ;;  %v4821_v24 = vld [vmem:[%s6635_s1 + $0x594] ss:$8 sps:$4 sm:$0xff]  }
 0x142   :  { %3292 = vmatmul.mubr.bf16.vlgmr.msra.gmra.mrb[0].mxu1 %v181_v42  ;;  %v4816_v23 = vld [vmem:[%s6635_s1 + $0xc80] ss:$8 sps:$4 sm:$0xff]   ;;  %v4824_v26 = vld [vmem:[%s6635_s1 + $0xc94] ss:$8 sps:$4 sm:$0xff]   ;;  %v4819_v49 = vld [vmem:[%s6635_s1 + $0x590] ss:$8 sps:$4 sm:$0xff]  }
 0x143   :  { %3579 = vmatmul.mubr.bf16.vlgmr.msra.gmra.mrb[0].mxu0 %v195_v43  ;;  %3301 = vmatpush1.bf16.msra.mxu1 %v4765_v44  ;;  %v4822_v27 = vld [vmem:[%s6635_s1 + $0xc90] ss:$8 sps:$4 sm:$0xff]   ;;  %v4827_v28 = vld [vmem:[%s6635_s1 + $0x5a4] ss:$8 sps:$4 sm:$0xff]   ;;  %v4825_v31 = vld [vmem:[%s6635_s1 + $0x5a0] ss:$8 sps:$4 sm:$0xff]  }
 0x144   :  { %3588 = vmatpush1.bf16.msra.mxu0 %v4768_v50  ;;  %3302 = vmatprep.subr.bf16.mxu1 %v4773_v45  ;;  %v4830_v30 = vld [vmem:[%s6635_s1 + $0xca4] ss:$8 sps:$4 sm:$0xff]   ;;  %v4828_v32 = vld [vmem:[%s6635_s1 + $0xca0] ss:$8 sps:$4 sm:$0xff]   ;;  %v4833_v33 = vld [vmem:[%s6635_s1 + $0x5b4] ss:$8 sps:$4 sm:$0xff]  }
 0x145   :  { %3589 = vmatprep.subr.bf16.mxu0 %v4776_v48  ;;  %3332 = vmatprep.mubr.bf16.mxu1 %v184_v52  ;;  %v4836_v34 = vld [vmem:[%s6635_s1 + $0xcb4] ss:$8 sps:$4 sm:$0xff]   ;;  %v4831_v37 = vld [vmem:[%s6635_s1 + $0x5b0] ss:$8 sps:$4 sm:$0xff]   ;;  %v4839_v5 = vld [vmem:[%s6635_s1 + $0x5c4] ss:$8 sps:$4 sm:$0xff]  }
 0x146   :  { %3619 = vmatprep.mubr.bf16.mxu0 %v198_v53  ;;  %v4834_v38 = vld [vmem:[%s6635_s1 + $0xcb0] ss:$8 sps:$4 sm:$0xff]   ;;  %v4842_v14 = vld [vmem:[%s6635_s1 + $0xcc4] ss:$8 sps:$4 sm:$0xff]   ;;  %v4837_v39 = vld [vmem:[%s6635_s1 + $0x5c0] ss:$8 sps:$4 sm:$0xff]  }
 0x147   :  { %3303 = vmatpush1.bf16.msra.mxu1 %v4771_v54  ;;  %v4840_v41 = vld [vmem:[%s6635_s1 + $0xcc0] ss:$8 sps:$4 sm:$0xff]   ;;  %v4845_v42 = vld [vmem:[%s6635_s1 + $0x5d4] ss:$8 sps:$4 sm:$0xff]   ;;  %v4843_v44 = vld [vmem:[%s6635_s1 + $0x5d0] ss:$8 sps:$4 sm:$0xff]  }
 0x148   :  { %3590 = vmatpush1.bf16.msra.mxu0 %v4774_v56  ;;  %3304 = vmatprep.subr.bf16.mxu1 %v4779_v57  ;;  %v4848_v43 = vld [vmem:[%s6635_s1 + $0xcd4] ss:$8 sps:$4 sm:$0xff]   ;;  %v4846_v50 = vld [vmem:[%s6635_s1 + $0xcd0] ss:$8 sps:$4 sm:$0xff]   ;;  %v4851_v45 = vld [vmem:[%s6635_s1 + $0x5e4] ss:$8 sps:$4 sm:$0xff]   ;;  %v66_v57 = vrot.slane %v5912_v18, %v5466_v25 }
 0x149   :  { %3591 = vmatprep.subr.bf16.mxu0 %v4782_v58  ;;  %v4854_v48 = vld [vmem:[%s6635_s1 + $0xce4] ss:$8 sps:$4 sm:$0xff]   ;;  %v4849_v52 = vld [vmem:[%s6635_s1 + $0x5e0] ss:$8 sps:$4 sm:$0xff]   ;;  %v4857_v54 = vld [vmem:[%s6635_s1 + $0x5f4] ss:$8 sps:$4 sm:$0xff]   ;;  %v122_v58 = vrot.slane %v6105_v35, %v5250_v4 }
 0x14a   :  { %v4852_v53 = vld [vmem:[%s6635_s1 + $0xce0] ss:$8 sps:$4 sm:$0xff]   ;;  %v4860_v56 = vld [vmem:[%s6635_s1 + $0xcf4] ss:$8 sps:$4 sm:$0xff]   ;;  %vm3730_vm0 = vcmp.lt.s32.totalorder %v23_v36, 160 }
 0x14b   :  { %3305 = vmatpush1.bf16.msra.mxu1 %v4777_v59  ;;  %v4855_v59 = vld [vmem:[%s6635_s1 + $0x5f0] ss:$8 sps:$4 sm:$0xff]  }
 0x14c   :  { %3592 = vmatpush1.bf16.msra.mxu0 %v4780_v60  ;;  %3306 = vmatprep.subr.bf16.mxu1 %v4785_v61  ;;  %v4858_v60 = vld [vmem:[%s6635_s1 + $0xcf0] ss:$8 sps:$4 sm:$0xff]   ;;  %v4863_v61 = vld [vmem:[%s6635_s1 + $0x604] ss:$8 sps:$4 sm:$0xff]  }
 0x14d   :  { %3593 = vmatprep.subr.bf16.mxu0 %v4788_v62  ;;  %v4866_v62 = vld [vmem:[%s6635_s1 + $0xd04] ss:$8 sps:$4 sm:$0xff]  }
 0x14f   :  { %3307 = vmatpush1.bf16.msra.mxu1 %v4783_v63  ;;  %v78_v63 = vrot.slane %v5912_v18, %v5478_v29  ;;  %v4869_v18 = vld [vmem:[%s6635_s1 + $0x614] ss:$8 sps:$4 sm:$0xff]  }
 0x150   :  { %3594 = vmatpush1.bf16.msra.mxu0 %v4786_v0  ;;  %3308 = vmatprep.subr.bf16.mxu1 %v4791_v1  ;;  %v134_v0 = vrot.slane %v6105_v35, %v5268_v10  ;;  %v183_v1 = vpack.c.bf16 %v66_v57, %v66_v57  ;;  %v4872_v10 = vld [vmem:[%s6635_s1 + $0xd14] ss:$8 sps:$4 sm:$0xff]   ;;  %v4927_v57 = vld [vmem:[%s6635_s1 + $0x6b0] ss:$8 sps:$4 sm:$0xff]  }
 0x151   :  { %3595 = vmatprep.subr.bf16.mxu0 %v4794_v2  ;;  %v197_v2 = vpack.c.bf16 %v122_v58, %v122_v58  ;;  %v4930_v58 = vld [vmem:[%s6635_s1 + $0xdb0] ss:$8 sps:$4 sm:$0xff]  }
 0x153   :  { %3309 = vmatpush1.bf16.msra.mxu1 %v4789_v3  ;;  %v4861_v3 = vld [vmem:[%s6635_s1 + $0x600] ss:$8 sps:$4 sm:$0xff]  }
 0x154   :  { %3596 = vmatpush1.bf16.msra.mxu0 %v4792_v51  ;;  %3310 = vmatprep.subr.bf16.mxu1 %v4797_v6  ;;  %v4864_v51 = vld [vmem:[%s6635_s1 + $0xd00] ss:$8 sps:$4 sm:$0xff]   ;;  %v186_v6 = vpack.c.bf16 %v78_v63, %v78_v63  ;;  %v4941_v63 = vld [vmem:[%s6635_s1 + $0x6d4] ss:$8 sps:$4 sm:$0xff]  }
 0x155   :  { %3597 = vmatprep.subr.bf16.mxu0 %v4800_v7  ;;  %v200_v7 = vpack.c.bf16 %v134_v0, %v134_v0  ;;  %v4944_v0 = vld [vmem:[%s6635_s1 + $0xdd4] ss:$8 sps:$4 sm:$0xff]  }
 0x157   :  { %3311 = vmatpush1.bf16.msra.mxu1 %v4795_v8  ;;  %v4867_v8 = vld [vmem:[%s6635_s1 + $0x610] ss:$8 sps:$4 sm:$0xff]  }
 0x158   :  { %3598 = vmatpush1.bf16.msra.mxu0 %v4798_v9  ;;  %3312 = vmatprep.subr.bf16.mxu1 %v4803_v11  ;;  %v4870_v9 = vld [vmem:[%s6635_s1 + $0xd10] ss:$8 sps:$4 sm:$0xff]   ;;  %v4875_v11 = vld [vmem:[%s6635_s1 + $0x624] ss:$8 sps:$4 sm:$0xff]  }
 0x159   :  { %3599 = vmatprep.subr.bf16.mxu0 %v4806_v12  ;;  %v4878_v12 = vld [vmem:[%s6635_s1 + $0xd24] ss:$8 sps:$4 sm:$0xff]  }
 0x15b   :  { %3313 = vmatpush1.bf16.msra.mxu1 %v4801_v13  ;;  %v4873_v13 = vld [vmem:[%s6635_s1 + $0x620] ss:$8 sps:$4 sm:$0xff]  }
 0x15c   :  { %3600 = vmatpush1.bf16.msra.mxu0 %v4804_v15  ;;  %3314 = vmatprep.subr.bf16.mxu1 %v4809_v16  ;;  %v4876_v15 = vld [vmem:[%s6635_s1 + $0xd20] ss:$8 sps:$4 sm:$0xff]   ;;  %v4881_v16 = vld [vmem:[%s6635_s1 + $0x634] ss:$8 sps:$4 sm:$0xff]  }
 0x15d   :  { %3601 = vmatprep.subr.bf16.mxu0 %v4812_v17  ;;  %v4884_v17 = vld [vmem:[%s6635_s1 + $0xd34] ss:$8 sps:$4 sm:$0xff]  }
 0x15f   :  { %3315 = vmatpush1.bf16.msra.mxu1 %v4807_v55  ;;  %v4879_v55 = vld [vmem:[%s6635_s1 + $0x630] ss:$8 sps:$4 sm:$0xff]  }
 0x160   :  { %3602 = vmatpush1.bf16.msra.mxu0 %v4810_v19  ;;  %3316 = vmatprep.subr.bf16.mxu1 %v4815_v20  ;;  %v4882_v19 = vld [vmem:[%s6635_s1 + $0xd30] ss:$8 sps:$4 sm:$0xff]   ;;  %v4887_v20 = vld [vmem:[%s6635_s1 + $0x644] ss:$8 sps:$4 sm:$0xff]  }
 0x161   :  { %3603 = vmatprep.subr.bf16.mxu0 %v4818_v21  ;;  %v4890_v21 = vld [vmem:[%s6635_s1 + $0xd44] ss:$8 sps:$4 sm:$0xff]  }
 0x163   :  { %3317 = vmatpush1.bf16.msra.mxu1 %v4813_v22  ;;  %v4885_v22 = vld [vmem:[%s6635_s1 + $0x640] ss:$8 sps:$4 sm:$0xff]  }
 0x164   :  { %3604 = vmatpush1.bf16.msra.mxu0 %v4816_v23  ;;  %3318 = vmatprep.subr.bf16.mxu1 %v4821_v24  ;;  %v4888_v23 = vld [vmem:[%s6635_s1 + $0xd40] ss:$8 sps:$4 sm:$0xff]   ;;  %v4893_v24 = vld [vmem:[%s6635_s1 + $0x654] ss:$8 sps:$4 sm:$0xff]  }
 0x165   :  { %3605 = vmatprep.subr.bf16.mxu0 %v4824_v26  ;;  %v4896_v26 = vld [vmem:[%s6635_s1 + $0xd54] ss:$8 sps:$4 sm:$0xff]  }
 0x167   :  { %3319 = vmatpush1.bf16.msra.mxu1 %v4819_v49  ;;  %v4891_v49 = vld [vmem:[%s6635_s1 + $0x650] ss:$8 sps:$4 sm:$0xff]  }
 0x168   :  { %3606 = vmatpush1.bf16.msra.mxu0 %v4822_v27  ;;  %3320 = vmatprep.subr.bf16.mxu1 %v4827_v28  ;;  %v4894_v27 = vld [vmem:[%s6635_s1 + $0xd50] ss:$8 sps:$4 sm:$0xff]   ;;  %v4899_v28 = vld [vmem:[%s6635_s1 + $0x664] ss:$8 sps:$4 sm:$0xff]  }
 0x169   :  { %3607 = vmatprep.subr.bf16.mxu0 %v4830_v30  ;;  %v4902_v30 = vld [vmem:[%s6635_s1 + $0xd64] ss:$8 sps:$4 sm:$0xff]  }
 0x16b   :  { %3321 = vmatpush1.bf16.msra.mxu1 %v4825_v31  ;;  %v4897_v31 = vld [vmem:[%s6635_s1 + $0x660] ss:$8 sps:$4 sm:$0xff]  }
 0x16c   :  { %3608 = vmatpush1.bf16.msra.mxu0 %v4828_v32  ;;  %3322 = vmatprep.subr.bf16.mxu1 %v4833_v33  ;;  %v4900_v32 = vld [vmem:[%s6635_s1 + $0xd60] ss:$8 sps:$4 sm:$0xff]   ;;  %v4905_v33 = vld [vmem:[%s6635_s1 + $0x674] ss:$8 sps:$4 sm:$0xff]  }
 0x16d   :  { %3609 = vmatprep.subr.bf16.mxu0 %v4836_v34  ;;  %v4908_v34 = vld [vmem:[%s6635_s1 + $0xd74] ss:$8 sps:$4 sm:$0xff]  }
 0x16f   :  { %3323 = vmatpush1.bf16.msra.mxu1 %v4831_v37  ;;  %v4903_v37 = vld [vmem:[%s6635_s1 + $0x670] ss:$8 sps:$4 sm:$0xff]  }
 0x170   :  { %3610 = vmatpush1.bf16.msra.mxu0 %v4834_v38  ;;  %3324 = vmatprep.subr.bf16.mxu1 %v4839_v5  ;;  %v4906_v38 = vld [vmem:[%s6635_s1 + $0xd70] ss:$8 sps:$4 sm:$0xff]   ;;  %v4911_v5 = vld [vmem:[%s6635_s1 + $0x684] ss:$8 sps:$4 sm:$0xff]  }
 0x171   :  { %3611 = vmatprep.subr.bf16.mxu0 %v4842_v14  ;;  %v4914_v14 = vld [vmem:[%s6635_s1 + $0xd84] ss:$8 sps:$4 sm:$0xff]  }
 0x173   :  { %3325 = vmatpush1.bf16.msra.mxu1 %v4837_v39  ;;  %v4909_v39 = vld [vmem:[%s6635_s1 + $0x680] ss:$8 sps:$4 sm:$0xff]  }
 0x174   :  { %3612 = vmatpush1.bf16.msra.mxu0 %v4840_v41  ;;  %3326 = vmatprep.subr.bf16.mxu1 %v4845_v42  ;;  %v4912_v41 = vld [vmem:[%s6635_s1 + $0xd80] ss:$8 sps:$4 sm:$0xff]   ;;  %v4917_v42 = vld [vmem:[%s6635_s1 + $0x694] ss:$8 sps:$4 sm:$0xff]  }
 0x175   :  { %3613 = vmatprep.subr.bf16.mxu0 %v4848_v43  ;;  %v4920_v43 = vld [vmem:[%s6635_s1 + $0xd94] ss:$8 sps:$4 sm:$0xff]  }
 0x177   :  { %3327 = vmatpush1.bf16.msra.mxu1 %v4843_v44  ;;  %v4915_v44 = vld [vmem:[%s6635_s1 + $0x690] ss:$8 sps:$4 sm:$0xff]  }
 0x178   :  { %3614 = vmatpush1.bf16.msra.mxu0 %v4846_v50  ;;  %3328 = vmatprep.subr.bf16.mxu1 %v4851_v45  ;;  %v4918_v50 = vld [vmem:[%s6635_s1 + $0xd90] ss:$8 sps:$4 sm:$0xff]   ;;  %v4923_v45 = vld [vmem:[%s6635_s1 + $0x6a4] ss:$8 sps:$4 sm:$0xff]  }
 0x179   :  { %3615 = vmatprep.subr.bf16.mxu0 %v4854_v48  ;;  %v4926_v48 = vld [vmem:[%s6635_s1 + $0xda4] ss:$8 sps:$4 sm:$0xff]  }
 0x17b   :  { %3329 = vmatpush1.bf16.msra.mxu1 %v4849_v52  ;;  %v4921_v52 = vld [vmem:[%s6635_s1 + $0x6a0] ss:$8 sps:$4 sm:$0xff]  }
 0x17c   :  { %3616 = vmatpush1.bf16.msra.mxu0 %v4852_v53  ;;  %3330 = vmatprep.subr.bf16.mxu1 %v4857_v54  ;;  %v4924_v53 = vld [vmem:[%s6635_s1 + $0xda0] ss:$8 sps:$4 sm:$0xff]   ;;  %v4929_v54 = vld [vmem:[%s6635_s1 + $0x6b4] ss:$8 sps:$4 sm:$0xff]  }
 0x17d   :  { %3617 = vmatprep.subr.bf16.mxu0 %v4860_v56  ;;  %v4932_v56 = vld [vmem:[%s6635_s1 + $0xdb4] ss:$8 sps:$4 sm:$0xff]  }
 0x17f   :  { %3331 = vmatpush1.bf16.msra.mxu1 %v4855_v59  ;;  %v4935_v59 = vld [vmem:[%s6635_s1 + $0x6c4] ss:$8 sps:$4 sm:$0xff]  }
 0x180   :  { %3618 = vmatpush1.bf16.msra.mxu0 %v4858_v60  ;;  %3341 = vmatprep.subr.bf16.mxu1 %v4863_v61  ;;  %v4938_v60 = vld [vmem:[%s6635_s1 + $0xdc4] ss:$8 sps:$4 sm:$0xff]   ;;  %v4933_v61 = vld [vmem:[%s6635_s1 + $0x6c0] ss:$8 sps:$4 sm:$0xff]  }
 0x181   :  { %3628 = vmatprep.subr.bf16.mxu0 %v4866_v62  ;;  %v4936_v62 = vld [vmem:[%s6635_s1 + $0xdc0] ss:$8 sps:$4 sm:$0xff]  }
 0x182   :  { %3333 = vmatmul.mubr.bf16.vlgmr.msra.gmra.mrb[0].mxu1 %v183_v1  ;;  %v4939_v1 = vld [vmem:[%s6635_s1 + $0x6d0] ss:$8 sps:$4 sm:$0xff]  }
 0x183   :  { %3620 = vmatmul.mubr.bf16.vlgmr.msra.gmra.mrb[0].mxu0 %v197_v2  ;;  %3342 = vmatpush1.bf16.msra.mxu1 %v4861_v3  ;;  %v4942_v2 = vld [vmem:[%s6635_s1 + $0xdd0] ss:$8 sps:$4 sm:$0xff]   ;;  %v4947_v3 = vld [vmem:[%s6635_s1 + $0x6e4] ss:$8 sps:$4 sm:$0xff]  }
 0x184   :  { %3629 = vmatpush1.bf16.msra.mxu0 %v4864_v51  ;;  %3343 = vmatprep.subr.bf16.mxu1 %v4869_v18  ;;  %v4950_v51 = vld [vmem:[%s6635_s1 + $0xde4] ss:$8 sps:$4 sm:$0xff]   ;;  %v4945_v18 = vld [vmem:[%s6635_s1 + $0x6e0] ss:$8 sps:$4 sm:$0xff]  }
 0x185   :  { %3630 = vmatprep.subr.bf16.mxu0 %v4872_v10  ;;  %3373 = vmatprep.mubr.bf16.mxu1 %v186_v6  ;;  %v4948_v10 = vld [vmem:[%s6635_s1 + $0xde0] ss:$8 sps:$4 sm:$0xff]   ;;  %v4953_v6 = vld [vmem:[%s6635_s1 + $0x6f4] ss:$8 sps:$4 sm:$0xff]  }
 0x186   :  { %3660 = vmatprep.mubr.bf16.mxu0 %v200_v7  ;;  %v4956_v7 = vld [vmem:[%s6635_s1 + $0xdf4] ss:$8 sps:$4 sm:$0xff]  }
 0x187   :  { %3344 = vmatpush1.bf16.msra.mxu1 %v4867_v8  ;;  %v5008_v8 = vld [vmem:[%s6634_s0 + $0x8] sm:$0xff] }
 0x188   :  { %3631 = vmatpush1.bf16.msra.mxu0 %v4870_v9  ;;  %3345 = vmatprep.subr.bf16.mxu1 %v4875_v11  ;;  %v74_v9 = vrot.slane %v5008_v8, %v5672_v47  ;;  %v130_v11 = vrot.slane %v6105_v35, %v5466_v25 }
 0x189   :  { %3632 = vmatprep.subr.bf16.mxu0 %v4878_v12  ;;  %v4951_v12 = vld [vmem:[%s6635_s1 + $0x6f0] ss:$8 sps:$4 sm:$0xff]  }
 0x18a   :  { %v185_v25 = vpack.c.bf16 %v74_v9, %v74_v9 }
 0x18b   :  { %3346 = vmatpush1.bf16.msra.mxu1 %v4873_v13  ;;  %v4954_v13 = vld [vmem:[%s6635_s1 + $0xdf0] ss:$8 sps:$4 sm:$0xff]  }
 0x18c   :  { %3633 = vmatpush1.bf16.msra.mxu0 %v4876_v15  ;;  %3347 = vmatprep.subr.bf16.mxu1 %v4881_v16  ;;  %v142_v15 = vrot.slane %v6105_v35, %v5478_v29  ;;  %v4959_v16 = vld [vmem:[%s6635_s1 + $0xe04] ss:$8 sps:$4 sm:$0xff]   ;;  %v4962_v29 = vld [vmem:[%s6635_s1 + $0xe14] ss:$8 sps:$4 sm:$0xff]  }
 0x18d   :  { %3634 = vmatprep.subr.bf16.mxu0 %v4884_v17  ;;  %v199_v17 = vpack.c.bf16 %v130_v11, %v130_v11 }
 0x18f   :  { %3348 = vmatpush1.bf16.msra.mxu1 %v4879_v55  ;;  %v4957_v55 = vld [vmem:[%s6635_s1 + $0xe00] ss:$8 sps:$4 sm:$0xff]  }
 0x190   :  { %3635 = vmatpush1.bf16.msra.mxu0 %v4882_v19  ;;  %3349 = vmatprep.subr.bf16.mxu1 %v4887_v20  ;;  %v202_v19 = vpack.c.bf16 %v142_v15, %v142_v15  ;;  %v4960_v20 = vld [vmem:[%s6635_s1 + $0xe10] ss:$8 sps:$4 sm:$0xff]  }
 0x191   :  { %3636 = vmatprep.subr.bf16.mxu0 %v4890_v21  ;;  %v4965_v21 = vld [vmem:[%s6635_s1 + $0xe24] ss:$8 sps:$4 sm:$0xff]  }
 0x193   :  { %3350 = vmatpush1.bf16.msra.mxu1 %v4885_v22  ;;  %v4963_v22 = vld [vmem:[%s6635_s1 + $0xe20] ss:$8 sps:$4 sm:$0xff]  }
 0x194   :  { %3637 = vmatpush1.bf16.msra.mxu0 %v4888_v23  ;;  %3351 = vmatprep.subr.bf16.mxu1 %v4893_v24  ;;  %v4968_v23 = vld [vmem:[%s6635_s1 + $0xe34] ss:$8 sps:$4 sm:$0xff]   ;;  %v4966_v24 = vld [vmem:[%s6635_s1 + $0xe30] ss:$8 sps:$4 sm:$0xff]  }
 0x195   :  { %3638 = vmatprep.subr.bf16.mxu0 %v4896_v26  ;;  %v4971_v26 = vld [vmem:[%s6635_s1 + $0xe44] ss:$8 sps:$4 sm:$0xff]  }
 0x197   :  { %3352 = vmatpush1.bf16.msra.mxu1 %v4891_v49  ;;  %v4969_v49 = vld [vmem:[%s6635_s1 + $0xe40] ss:$8 sps:$4 sm:$0xff]  }
 0x198   :  { %3639 = vmatpush1.bf16.msra.mxu0 %v4894_v27  ;;  %3353 = vmatprep.subr.bf16.mxu1 %v4899_v28  ;;  %v4974_v27 = vld [vmem:[%s6635_s1 + $0xe54] ss:$8 sps:$4 sm:$0xff]   ;;  %v4972_v28 = vld [vmem:[%s6635_s1 + $0xe50] ss:$8 sps:$4 sm:$0xff]  }
 0x199   :  { %3640 = vmatprep.subr.bf16.mxu0 %v4902_v30  ;;  %v4977_v30 = vld [vmem:[%s6635_s1 + $0xe64] ss:$8 sps:$4 sm:$0xff]  }
 0x19b   :  { %3354 = vmatpush1.bf16.msra.mxu1 %v4897_v31  ;;  %v4975_v31 = vld [vmem:[%s6635_s1 + $0xe60] ss:$8 sps:$4 sm:$0xff]  }
 0x19c   :  { %3641 = vmatpush1.bf16.msra.mxu0 %v4900_v32  ;;  %3355 = vmatprep.subr.bf16.mxu1 %v4905_v33  ;;  %v4980_v32 = vld [vmem:[%s6635_s1 + $0xe74] ss:$8 sps:$4 sm:$0xff]   ;;  %v4978_v33 = vld [vmem:[%s6635_s1 + $0xe70] ss:$8 sps:$4 sm:$0xff]  }
 0x19d   :  { %3642 = vmatprep.subr.bf16.mxu0 %v4908_v34  ;;  %v4983_v34 = vld [vmem:[%s6635_s1 + $0xe84] ss:$8 sps:$4 sm:$0xff]  }
 0x19f   :  { %3356 = vmatpush1.bf16.msra.mxu1 %v4903_v37  ;;  %v4981_v37 = vld [vmem:[%s6635_s1 + $0xe80] ss:$8 sps:$4 sm:$0xff]  }
 0x1a0   :  { %3643 = vmatpush1.bf16.msra.mxu0 %v4906_v38  ;;  %3357 = vmatprep.subr.bf16.mxu1 %v4911_v5  ;;  %v4986_v38 = vld [vmem:[%s6635_s1 + $0xe94] ss:$8 sps:$4 sm:$0xff]   ;;  %v4984_v5 = vld [vmem:[%s6635_s1 + $0xe90] ss:$8 sps:$4 sm:$0xff]  }
 0x1a1   :  { %3644 = vmatprep.subr.bf16.mxu0 %v4914_v14  ;;  %v4989_v14 = vld [vmem:[%s6635_s1 + $0xea4] ss:$8 sps:$4 sm:$0xff]  }
 0x1a3   :  { %3358 = vmatpush1.bf16.msra.mxu1 %v4909_v39  ;;  %v4987_v39 = vld [vmem:[%s6635_s1 + $0xea0] ss:$8 sps:$4 sm:$0xff]  }
 0x1a4   :  { %3645 = vmatpush1.bf16.msra.mxu0 %v4912_v41  ;;  %3359 = vmatprep.subr.bf16.mxu1 %v4917_v42  ;;  %v4992_v41 = vld [vmem:[%s6635_s1 + $0xeb4] ss:$8 sps:$4 sm:$0xff]   ;;  %v4990_v42 = vld [vmem:[%s6635_s1 + $0xeb0] ss:$8 sps:$4 sm:$0xff]  }
 0x1a5   :  { %3646 = vmatprep.subr.bf16.mxu0 %v4920_v43  ;;  %v4995_v43 = vld [vmem:[%s6635_s1 + $0xec4] ss:$8 sps:$4 sm:$0xff]  }
 0x1a7   :  { %3360 = vmatpush1.bf16.msra.mxu1 %v4915_v44  ;;  %v4993_v44 = vld [vmem:[%s6635_s1 + $0xec0] ss:$8 sps:$4 sm:$0xff]  }
 0x1a8   :  { %3647 = vmatpush1.bf16.msra.mxu0 %v4918_v50  ;;  %3361 = vmatprep.subr.bf16.mxu1 %v4923_v45  ;;  %v4998_v50 = vld [vmem:[%s6635_s1 + $0xed4] ss:$8 sps:$4 sm:$0xff]   ;;  %v4996_v45 = vld [vmem:[%s6635_s1 + $0xed0] ss:$8 sps:$4 sm:$0xff]  }
 0x1a9   :  { %3648 = vmatprep.subr.bf16.mxu0 %v4926_v48  ;;  %v5001_v48 = vld [vmem:[%s6635_s1 + $0xee4] ss:$8 sps:$4 sm:$0xff]  }
 0x1ab   :  { %3362 = vmatpush1.bf16.msra.mxu1 %v4921_v52  ;;  %v4999_v52 = vld [vmem:[%s6635_s1 + $0xee0] ss:$8 sps:$4 sm:$0xff]  }
 0x1ac   :  { %3649 = vmatpush1.bf16.msra.mxu0 %v4924_v53  ;;  %3363 = vmatprep.subr.bf16.mxu1 %v4929_v54  ;;  %v5004_v53 = vld [vmem:[%s6635_s1 + $0xef4] ss:$8 sps:$4 sm:$0xff]   ;;  %v138_v54 = vrot.slane %v6105_v35, %v5672_v47 }
 0x1ad   :  { %3650 = vmatprep.subr.bf16.mxu0 %v4932_v56  ;;  %v5002_v56 = vld [vmem:[%s6635_s1 + $0xef0] ss:$8 sps:$4 sm:$0xff]   ;;  %s5034_s1 = smov [#allocation2]  }
 0x1af   :  { %3364 = vmatpush1.bf16.msra.mxu1 %v4927_v57  ;;  %v201_v57 = vpack.c.bf16 %v138_v54, %v138_v54 }
 0x1b0   :  { %3651 = vmatpush1.bf16.msra.mxu0 %v4930_v58  ;;  %3365 = vmatprep.subr.bf16.mxu1 %v4935_v59 }
 0x1b1   :  { %3652 = vmatprep.subr.bf16.mxu0 %v4938_v60 }
 0x1b3   :  { %3366 = vmatpush1.bf16.msra.mxu1 %v4933_v61 }
 0x1b4   :  { %3653 = vmatpush1.bf16.msra.mxu0 %v4936_v62  ;;  %3367 = vmatprep.subr.bf16.mxu1 %v4941_v63  ;;  %v683_v62 = vld [vmem:[%s6636_s2] sm:$0x3]  ;;  %v5033_v63 = vmov 1966171168   ;;  %s3739_s2 = sshll.u32 %s5034_s1, 4  ;;  %s3740_s2 = int_to_ptr.vmem [resolvable:$true] %s3739_s2 }
 0x1b5   :  { %3654 = vmatprep.subr.bf16.mxu0 %v4944_v0  ;;  %v3714_v0 = vunpack.c.l.s4 %v5033_v63  ;;  %v3088_v47 = vrot.slane %v683_v62, %v5250_v4  ;;  %v3092_v35 = vrot.slane %v683_v62, %v5191_v46  ;;  %s5009_s15 = scalar_lea.vmem %s3740_s2, 32  ;;  %p5014_p1 = scmp.lt.s32.totalorder %s3740_s2, %s3740_s2 }
 0x1b6   :  { %p5010_p0 = scmp.ne.s32.totalorder %s3740_s2, %s5009_s15  ;;  %p5015_p2 = scmp.lt.s32.totalorder %s5009_s15, %s5009_s15 }
 0x1b7   :  { %3368 = vmatpush1.bf16.msra.mxu1 %v4939_v1  ;;  %v3715_v1 = vunpack.c.0.s8 %v3714_v0 }
 0x1b8   :  { %3655 = vmatpush1.bf16.msra.mxu0 %v4942_v2  ;;  %3369 = vmatprep.subr.bf16.mxu1 %v4947_v3  ;;  %p5016_p3 = por %p5015_p2, %p5014_p1 }
 0x1b9   :  { %3656 = vmatprep.subr.bf16.mxu0 %v4950_v51 }
 0x1ba   :  { %p5017_p4 = pnand %p5016_p3, %p5010_p0 }
 0x1bb   :  { %3370 = vmatpush1.bf16.msra.mxu1 %v4945_v18 }
 0x1bc   :  { %3657 = vmatpush1.bf16.msra.mxu0 %v4948_v10  ;;  %3371 = vmatprep.subr.bf16.mxu1 %v4953_v6 }
 0x1bd   :  { %3658 = vmatprep.subr.bf16.mxu0 %v4956_v7  ;;  %v3718_v7 = vsub.s32 %v3715_v1, %v5173_v40 }
 0x1bf   :  { %3372 = vmatpush1.bf16.msra.mxu1 %v4951_v12 }
 0x1c0   :  { %3659 = vmatpush1.bf16.msra.mxu0 %v4954_v13 }
 0x1c1   :  { %3669 = vmatprep.subr.bf16.mxu0 %v4959_v16 }
 0x1c2   :  { %3374 = vmatmul.mubr.bf16.vlgmr.msra.gmra.mrb[0].mxu1 %v185_v25 }
 0x1c3   :  { %3661 = vmatmul.mubr.bf16.vlgmr.msra.gmra.mrb[0].mxu0 %v199_v17 }
 0x1c4   :  { %3670 = vmatpush1.bf16.msra.mxu0 %v4957_v55  ;;  %3701 = vmatprep.mubr.bf16.mxu0 %v202_v19 }
 0x1c5   :  { %3671 = vmatprep.subr.bf16.mxu0 %v4962_v29 }
 0x1c8   :  { %3672 = vmatpush1.bf16.msra.mxu0 %v4960_v20 }
 0x1c9   :  { %3673 = vmatprep.subr.bf16.mxu0 %v4965_v21 }
 0x1cc   :  { %3674 = vmatpush1.bf16.msra.mxu0 %v4963_v22 }
 0x1cd   :  { %3675 = vmatprep.subr.bf16.mxu0 %v4968_v23 }
 0x1d0   :  { %3676 = vmatpush1.bf16.msra.mxu0 %v4966_v24 }
 0x1d1   :  { %3677 = vmatprep.subr.bf16.mxu0 %v4971_v26 }
 0x1d4   :  { %3678 = vmatpush1.bf16.msra.mxu0 %v4969_v49 }
 0x1d5   :  { %3679 = vmatprep.subr.bf16.mxu0 %v4974_v27 }
 0x1d8   :  { %3680 = vmatpush1.bf16.msra.mxu0 %v4972_v28 }
 0x1d9   :  { %3681 = vmatprep.subr.bf16.mxu0 %v4977_v30 }
 0x1dc   :  { %3682 = vmatpush1.bf16.msra.mxu0 %v4975_v31 }
 0x1dd   :  { %3683 = vmatprep.subr.bf16.mxu0 %v4980_v32 }
 0x1e0   :  { %3684 = vmatpush1.bf16.msra.mxu0 %v4978_v33 }
 0x1e1   :  { %3685 = vmatprep.subr.bf16.mxu0 %v4983_v34 }
 0x1e4   :  { %3686 = vmatpush1.bf16.msra.mxu0 %v4981_v37 }
 0x1e5   :  { %3687 = vmatprep.subr.bf16.mxu0 %v4986_v38 }
 0x1e8   :  { %3688 = vmatpush1.bf16.msra.mxu0 %v4984_v5 }
 0x1e9   :  { %3689 = vmatprep.subr.bf16.mxu0 %v4989_v14 }
 0x1ec   :  { %3690 = vmatpush1.bf16.msra.mxu0 %v4987_v39 }
 0x1ed   :  { %3691 = vmatprep.subr.bf16.mxu0 %v4992_v41 }
 0x1f0   :  { %3692 = vmatpush1.bf16.msra.mxu0 %v4990_v42 }
 0x1f1   :  { %3693 = vmatprep.subr.bf16.mxu0 %v4995_v43 }
 0x1f4   :  { %3694 = vmatpush1.bf16.msra.mxu0 %v4993_v44 }
 0x1f5   :  { %3695 = vmatprep.subr.bf16.mxu0 %v4998_v50 }
 0x1f8   :  { %3696 = vmatpush1.bf16.msra.mxu0 %v4996_v45 }
 0x1f9   :  { %3697 = vmatprep.subr.bf16.mxu0 %v5001_v48 }
 0x1fc   :  { %3698 = vmatpush1.bf16.msra.mxu0 %v4999_v52 }
 0x1fd   :  { %3699 = vmatprep.subr.bf16.mxu0 %v5004_v53 }
 0x200   :  { %3700 = vmatpush1.bf16.msra.mxu0 %v5002_v56 }
 0x203   :  { %3702 = vmatmul.mubr.bf16.vlgmr.msra.gmra.mrb[0].mxu0 %v201_v57 }
 0x295   :  { %v3375_v58 = vpop.f32.mrb[0].mxu1 }
 0x296   :  { %v3377_v59 = vpop.f32.mrb[1].mxu1  ;;  %v4227_v2 = vadd.f32 %v3375_v58, %v3088_v47 }
 0x297   :  { %v3379_v60 = vpop.f32.mrb[2].mxu1  ;;  %v4229_v3 = vadd.f32 %v3377_v59, %v3092_v35 }
 0x298   :  { %v3380_v61 = vpop.f32.mrb[3].mxu1 }
 0x2d6   :  { %v3703_v51 = vpop.f32.mrb[0].mxu0 }
 0x2d7   :  { %v4228_v18 = vadd.f32 %v4227_v2, %v3703_v51  ;;  %v3705_v10 = vpop.f32.mrb[1].mxu0 }
 0x2d8   :  { %v4230_v6 = vadd.f32 %v4229_v3, %v3705_v10  ;;  %v3707_v8 = vpop.f32.mrb[2].mxu0 }
 0x2d9   :  { %v3708_v9 = vpop.f32.mrb[3].mxu0 }
 0x2da   :  { %v3712_v11 = vcombine.low %v4228_v18, %v4230_v6 }
 0x2dc   :  { %v3719_v12 = vrot.slane %v3712_v11, %v3718_v7 }
 0x2de   :  { %v3726_v4 = vrot.slane %v3719_v12, %v3718_v7 }
 0x2e0   :  { %3732 = vst.msk [vmem:[#allocation2] sm:$0x3] %vm3730_vm0, %v3726_v4 }
 0x2e1   :  { %5020 = shalt.err (!%p5017_p4)
}
 0x2e2   :  { %s5021_s18 = scalar_lea.hbm %s6637_s3, 32 }
 0x2e3   :  { %p5022_p5 = scmp.ne.s32.totalorder %s6637_s3, %s5021_s18  ;;  %p5025_p6 = scmp.lt.u32.totalorder %s5021_s18, %s6637_s3 }
 0x2e5   :  { %p5027_p7 = pnand %p5025_p6, %p5022_p5 }
 0x2e7   :  { %5030 = shalt.err (!%p5027_p7)
}
 0x2e8   :  { %3742 = dma.vmem_to_hbm [thread:$0]  %s3740_s2, 32, %s6637_s3, [#allocation3]  }
 0x2e9   :  { %5031 = dma.done.wait [#allocation3], 32  }
 0x2ea   :  { %5032 = vsyncadd [#allocation3], 4294967264 }
 0x2eb   :  { %3746 = vsyncpa [#allocation3], 1 }

</bundles_post_ra>
